<compile_context>
chip_gen: v6e
topology: v6e:2x2x1
jax: 0.10.0
libtpu: 0.0.40
codegen_flags: <defaults>
</compile_context>

<pallas_src>
import jax
import jax.numpy as jnp
import numpy as np
from jax.experimental import pallas as pl
from jax.experimental.pallas import tpu as pltpu

# ----------------------------- sizes ----------------------------------------
B = 2          # batch
S_EN = 8       # english (source) sequence length
T_CH = 9       # chinese (target) sequence length
T_DEC = T_CH - 1
E = 32         # embedding dim
H = 32         # GRU hidden dim (encoder == decoder hidden)
EN_V = 16      # english vocab
CH_V = 32      # chinese vocab (decoder.output_dim)

# packed-slab row offsets (all multiples of 8 -> sublane aligned)
_W_ENC_WIH = 0
_W_ENC_WHH = E
_W_DEC_WIE = E + H
_W_DEC_WIC = 2 * E + H
_W_DEC_WHH = 2 * E + 2 * H
_W_ROWS = 2 * E + 3 * H          # 160

_N_IDX_EN = S_EN * B             # 16
_N_IDX_DEC = T_DEC * B           # 16
_N_IDX_LBL = T_DEC * B           # 16


# ===================== fused encoder + decoder + CE kernel ===================
def _fused_kernel(idx_ref, emb_ref, w3h_ref, bias_ref, fcw_ref, loss_ref):
    # ---------------- unpack the packed operand slabs (static slices) --------
    idx = idx_ref[...]                                   # (48, 1) i32
    en_idx = idx[0:_N_IDX_EN, :]                         # (S*B, 1)
    dec_idx = idx[_N_IDX_EN:_N_IDX_EN + _N_IDX_DEC, :]   # (T*B, 1)
    lbl = idx[_N_IDX_EN + _N_IDX_DEC:, :]                # (T*B, 1)

    en_tab = emb_ref[0:EN_V, :]                          # (EN_V, E)
    ch_tab = emb_ref[EN_V:EN_V + CH_V, :]                # (CH_V, E)

    enc_wih = w3h_ref[_W_ENC_WIH:_W_ENC_WIH + E, :]      # (E, 3H)
    enc_whh = w3h_ref[_W_ENC_WHH:_W_ENC_WHH + H, :]      # (H, 3H)
    dec_wie = w3h_ref[_W_DEC_WIE:_W_DEC_WIE + E, :]      # (E, 3H)
    dec_wic = w3h_ref[_W_DEC_WIC:_W_DEC_WIC + H, :]      # (H, 3H)
    dec_whh = w3h_ref[_W_DEC_WHH:_W_DEC_WHH + H, :]      # (H, 3H)

    enc_bih = bias_ref[0:1, :]                           # (1, 3H)
    enc_bhh = bias_ref[1:2, :]
    dec_bih = bias_ref[2:3, :]
    dec_bhh = bias_ref[3:4, :]
    fc_b = bias_ref[4:5, :][:, 0:CH_V]                   # (1, V)

    fc_wh = fcw_ref[0:H, :]                              # (H, V)
    fc_wc = fcw_ref[H:2 * H, :]                          # (H, V)

    # ---------- in-kernel embedding lookup (one-hot matmul, tables in VMEM) ---
    col_en = jax.lax.broadcasted_iota(jnp.int32, (S_EN * B, EN_V), 1)
    oh_en = jnp.where(col_en == en_idx, 1.0, 0.0).astype(jnp.float32)
    en_emb = jnp.dot(oh_en, en_tab, preferred_element_type=jnp.float32)   # (S*B, E)

    # ---------- encoder GRU (unrolled; input-gate matmul hoisted out) ---------
    xg_all = jnp.dot(en_emb, enc_wih,
                     preferred_element_type=jnp.float32) + enc_bih        # (S*B, 3H)
    h = jnp.zeros((B, H), jnp.float32)
    hs = []                                              # per-step hiddens stay in registers
    for s in range(S_EN):                                # fully unrolled, static slices
        xg = xg_all[s * B:(s + 1) * B, :]                # (B, 3H)
        hg = jnp.dot(h, enc_whh, preferred_element_type=jnp.float32) + enc_bhh
        r = jax.nn.sigmoid(xg[:, :H] + hg[:, :H])
        z = jax.nn.sigmoid(xg[:, H:2 * H] + hg[:, H:2 * H])
        n = jnp.tanh(xg[:, 2 * H:] + r * hg[:, 2 * H:])
        h = (1.0 - z) * n + z * h
        hs.append(h)
    enc_h = h                                            # (B, H)

    # ---------- dot-product attention, decomposed over source steps ----------
    # (hidden == enc_h at every decode step, so attention / context are
    #  step-invariant and computed once; enc_out is never materialized.)
    sc = [jnp.sum(hs[s] * enc_h, axis=1, keepdims=True) for s in range(S_EN)]  # each (B,1)
    m = sc[0]
    for s in range(1, S_EN):
        m = jnp.maximum(m, sc[s])
    e = [jnp.exp(sc[s] - m) for s in range(S_EN)]
    denom = e[0]
    for s in range(1, S_EN):
        denom = denom + e[s]
    ctx = e[0] * hs[0]
    for s in range(1, S_EN):
        ctx = ctx + e[s] * hs[s]
    context = ctx / denom                                # (B, H), softmax over s per batch

    # ---------- decoder: all T steps batched into 2-D (T*B, .) matmuls --------
    col_ch = jax.lax.broadcasted_iota(jnp.int32, (T_DEC * B, CH_V), 1)
    oh_ch = jnp.where(col_ch == dec_idx, 1.0, 0.0).astype(jnp.float32)
    dec_emb = jnp.dot(oh_ch, ch_tab, preferred_element_type=jnp.float32)  # (T*B, E)

    # batch-broadcast via one-hot matmul (replaces every jnp.tile)
    rmod = jax.lax.broadcasted_iota(jnp.int32, (T_DEC * B, B), 0) % B
    cb = jax.lax.broadcasted_iota(jnp.int32, (T_DEC * B, B), 1)
    oh_b = jnp.where(rmod == cb, 1.0, 0.0).astype(jnp.float32)            # (T*B, B)

    ctx_gate = jnp.dot(context, dec_wic,
                       preferred_element_type=jnp.float32) + dec_bih      # (B, 3H)
    hg_b = jnp.dot(enc_h, dec_whh,
                   preferred_element_type=jnp.float32) + dec_bhh          # (B, 3H)

    xg = (jnp.dot(dec_emb, dec_wie, preferred_element_type=jnp.float32)
          + jnp.dot(oh_b, ctx_gate, preferred_element_type=jnp.float32))  # (T*B, 3H)
    hg = jnp.dot(oh_b, hg_b, preferred_element_type=jnp.float32)          # (T*B, 3H)
    h_prev = jnp.dot(oh_b, enc_h, preferred_element_type=jnp.float32)     # (T*B, H)

    # one full-slab activation pass (amortizes EUP work)
    r = jax.nn.sigmoid(xg[:, :H] + hg[:, :H])
    z = jax.nn.sigmoid(xg[:, H:2 * H] + hg[:, H:2 * H])
    n = jnp.tanh(xg[:, 2 * H:] + r * hg[:, 2 * H:])
    h_new = (1.0 - z) * n + z * h_prev                                    # (T*B, H)

    ctx_out = jnp.dot(context, fc_wc,
                      preferred_element_type=jnp.float32) + fc_b          # (B, V)
    logits = (jnp.dot(h_new, fc_wh, preferred_element_type=jnp.float32)
              + jnp.dot(oh_b, ctx_out, preferred_element_type=jnp.float32))  # (T*B, V)

    # ---------- mean cross-entropy (logits never leave VMEM) ------------------
    mx = jnp.max(logits, axis=1, keepdims=True)
    lse = mx + jnp.log(jnp.sum(jnp.exp(logits - mx), axis=1, keepdims=True))
    col_v = jax.lax.broadcasted_iota(jnp.int32, logits.shape, 1)
    picked = jnp.sum(jnp.where(col_v == lbl, logits, 0.0), axis=1, keepdims=True)
    loss = jnp.mean(lse - picked)
    loss_ref[...] = jnp.full((1, 1), loss, dtype=loss_ref.dtype)


# ========================= parameter packing (once, at init) =================
def pack_params(p):
    fc_b_pad = jnp.pad(p['fc_b'], ((0, 0), (0, 3 * H - CH_V)))  # pad (1,V) -> (1,3H)
    return {
        'emb':  jnp.concatenate([p['en_embed'], p['ch_embed']], axis=0),          # (48, 32)
        'w3h':  jnp.concatenate([p['enc_wih'], p['enc_whh'], p['dec_wie'],
                                 p['dec_wic'], p['dec_whh']], axis=0),             # (160, 96)
        'bias': jnp.concatenate([p['enc_bih'], p['enc_bhh'], p['dec_bih'],
                                 p['dec_bhh'], fc_b_pad], axis=0),                 # (5, 96)
        'fcw':  jnp.concatenate([p['fc_wh'], p['fc_wc']], axis=0),                 # (64, 32)
    }


# ============================ full forward ====================================
@jax.jit
def seq2seq_attention_loss(packed, en_index, ch_index):
    # tiny int32 index re-layout (time-major flattened, row = t*B + b),
    # packed into a single (48, 1) array -> one DMA instead of three.
    en_idx_tm = en_index.T.reshape(S_EN * B, 1)
    dec_idx_tm = ch_index[:, :-1].T.reshape(T_DEC * B, 1)    # teacher forcing
    lbl_tm = ch_index[:, 1:].T.reshape(T_DEC * B, 1)
    idx_all = jnp.concatenate([en_idx_tm, dec_idx_tm, lbl_tm], axis=0).astype(jnp.int32)

    loss = pl.pallas_call(
        _fused_kernel,
        out_shape=jax.ShapeDtypeStruct((1, 1), jnp.float32),
        cost_estimate=pl.CostEstimate(flops=400_000, transcendentals=4_000,
                                      bytes_accessed=80_000),
    )(idx_all, packed['emb'], packed['w3h'], packed['bias'], packed['fcw'])
    return loss[0, 0]


# ======================== pure-JAX reference ==================================
def _gru_cell_ref(x, h, wih, whh, bih, bhh):
    xg = x @ wih + bih
    hg = h @ whh + bhh
    r = jax.nn.sigmoid(xg[:, :H] + hg[:, :H])
    z = jax.nn.sigmoid(xg[:, H:2 * H] + hg[:, H:2 * H])
    n = jnp.tanh(xg[:, 2 * H:] + r * hg[:, 2 * H:])
    return (1.0 - z) * n + z * h


def reference_loss(p, en_index, ch_index):
    en_emb = p['en_embed'][en_index]                           # (B, S, E)

    def step(h, x):
        h2 = _gru_cell_ref(x, h, p['enc_wih'], p['enc_whh'], p['enc_bih'], p['enc_bhh'])
        return h2, h2

    enc_h, enc_out = jax.lax.scan(step, jnp.zeros((B, H), jnp.float32),
                                  jnp.transpose(en_emb, (1, 0, 2)))  # (S,B,H)

    T = ch_index.shape[1] - 1
    logits_steps = []
    for t in range(T):
        emb = p['ch_embed'][ch_index[:, t]]                    # (B, E)
        scores = jnp.sum(enc_out * enc_h[None], axis=-1)       # (S, B)
        attn = jax.nn.softmax(scores, axis=0)
        context = jnp.sum(attn[:, :, None] * enc_out, axis=0)  # (B, H)
        xg = emb @ p['dec_wie'] + context @ p['dec_wic'] + p['dec_bih']
        hg = enc_h @ p['dec_whh'] + p['dec_bhh']
        r = jax.nn.sigmoid(xg[:, :H] + hg[:, :H])
        z = jax.nn.sigmoid(xg[:, H:2 * H] + hg[:, H:2 * H])
        n = jnp.tanh(xg[:, 2 * H:] + r * hg[:, 2 * H:])
        h_new = (1.0 - z) * n + z * enc_h
        logit = h_new @ p['fc_wh'] + context @ p['fc_wc'] + p['fc_b']
        logits_steps.append(logit)

    logits = jnp.stack(logits_steps, axis=1).reshape(-1, CH_V)  # (B*T, V)
    labels = ch_index[:, 1:].reshape(-1)
    logp = jax.nn.log_softmax(logits, axis=-1)
    nll = -logp[jnp.arange(labels.shape[0]), labels]
    return jnp.mean(nll)


# ============================== driver ========================================
def init_params(key):
    ks = jax.random.split(key, 12)
    s = 0.1
    return {
        'en_embed': jax.random.normal(ks[0], (EN_V, E), jnp.float32) * s,
        'enc_wih':  jax.random.normal(ks[1], (E, 3 * H), jnp.float32) * s,
        'enc_whh':  jax.random.normal(ks[2], (H, 3 * H), jnp.float32) * s,
        'enc_bih':  jax.random.normal(ks[3], (1, 3 * H), jnp.float32) * s,
        'enc_bhh':  jax.random.normal(ks[4], (1, 3 * H), jnp.float32) * s,
        'ch_embed': jax.random.normal(ks[5], (CH_V, E), jnp.float32) * s,
        'dec_wie':  jax.random.normal(ks[6], (E, 3 * H), jnp.float32) * s,
        'dec_wic':  jax.random.normal(ks[7], (H, 3 * H), jnp.float32) * s,
        'dec_whh':  jax.random.normal(ks[8], (H, 3 * H), jnp.float32) * s,
        'dec_bih':  jnp.zeros((1, 3 * H), jnp.float32),
        'dec_bhh':  jnp.zeros((1, 3 * H), jnp.float32),
        'fc_wh':    jax.random.normal(ks[9], (H, CH_V), jnp.float32) * s,
        'fc_wc':    jax.random.normal(ks[10], (H, CH_V), jnp.float32) * s,
        'fc_b':     jax.random.normal(ks[11], (1, CH_V), jnp.float32) * s,
    }


if __name__ == "__main__":
    key = jax.random.PRNGKey(0)
    kp, ke, kc = jax.random.split(key, 3)
    params = init_params(kp)
    packed = jax.tree_util.tree_map(jax.block_until_ready, pack_params(params))

    en_index = jax.random.randint(ke, (B, S_EN), 0, EN_V, dtype=jnp.int32)
    ch_index = jax.random.randint(kc, (B, T_CH), 0, CH_V, dtype=jnp.int32)

    loss = seq2seq_attention_loss(packed, en_index, ch_index)
    loss = jax.block_until_ready(loss)

    ref = jax.block_until_ready(reference_loss(params, en_index, ch_index))
    np.testing.assert_allclose(np.asarray(loss), np.asarray(ref), rtol=2e-3, atol=2e-3)

    # TODO(synk): translate() (autoregressive greedy decode over Python dicts with an
    # unbounded while-loop) has no static-shape Pallas equivalent and is not implemented.
    print("KERNEL_OK")
</pallas_src>

<mosaic_0001>
module attributes {stable_mosaic.version = 11 : i64} {
  func.func @_fused_kernel(%arg0: memref<48x1xi32, #tpu.memory_space<vmem>>, %arg1: memref<48x32xf32, #tpu.memory_space<vmem>>, %arg2: memref<160x96xf32, #tpu.memory_space<vmem>>, %arg3: memref<5x96xf32, #tpu.memory_space<vmem>>, %arg4: memref<64x32xf32, #tpu.memory_space<vmem>>, %arg5: memref<1x1xf32, #tpu.memory_space<vmem>>) attributes {dimension_semantics = [], scalar_prefetch = 0 : i64, scratch_operands = 0 : i64, tpu.core_type = #tpu.core_type<tc>} {
    %c0 = arith.constant 0 : index
    %c0_0 = arith.constant 0 : index
    %0 = vector.load %arg0[%c0, %c0_0] : memref<48x1xi32, #tpu.memory_space<vmem>>, vector<48x1xi32>
    %1 = vector.extract_strided_slice %0 {offsets = [0, 0], sizes = [16, 1], strides = [1, 1]} : vector<48x1xi32> to vector<16x1xi32>
    %2 = vector.extract_strided_slice %0 {offsets = [16, 0], sizes = [16, 1], strides = [1, 1]} : vector<48x1xi32> to vector<16x1xi32>
    %3 = vector.extract_strided_slice %0 {offsets = [32, 0], sizes = [16, 1], strides = [1, 1]} : vector<48x1xi32> to vector<16x1xi32>
    %c0_1 = arith.constant 0 : index
    %c0_2 = arith.constant 0 : index
    %4 = vector.load %arg1[%c0_1, %c0_2] : memref<48x32xf32, #tpu.memory_space<vmem>>, vector<16x32xf32>
    %c16 = arith.constant 16 : index
    %c0_3 = arith.constant 0 : index
    %5 = vector.load %arg1[%c16, %c0_3] : memref<48x32xf32, #tpu.memory_space<vmem>>, vector<32x32xf32>
    %c0_4 = arith.constant 0 : index
    %c0_5 = arith.constant 0 : index
    %6 = vector.load %arg2[%c0_4, %c0_5] : memref<160x96xf32, #tpu.memory_space<vmem>>, vector<32x96xf32>
    %c32 = arith.constant 32 : index
    %c0_6 = arith.constant 0 : index
    %7 = vector.load %arg2[%c32, %c0_6] : memref<160x96xf32, #tpu.memory_space<vmem>>, vector<32x96xf32>
    %c64 = arith.constant 64 : index
    %c0_7 = arith.constant 0 : index
    %8 = vector.load %arg2[%c64, %c0_7] : memref<160x96xf32, #tpu.memory_space<vmem>>, vector<32x96xf32>
    %c96 = arith.constant 96 : index
    %c0_8 = arith.constant 0 : index
    %9 = vector.load %arg2[%c96, %c0_8] : memref<160x96xf32, #tpu.memory_space<vmem>>, vector<32x96xf32>
    %c128 = arith.constant 128 : index
    %c0_9 = arith.constant 0 : index
    %10 = vector.load %arg2[%c128, %c0_9] : memref<160x96xf32, #tpu.memory_space<vmem>>, vector<32x96xf32>
    %c0_10 = arith.constant 0 : index
    %c0_11 = arith.constant 0 : index
    %11 = vector.load %arg3[%c0_10, %c0_11] : memref<5x96xf32, #tpu.memory_space<vmem>>, vector<1x96xf32>
    %c1 = arith.constant 1 : index
    %c0_12 = arith.constant 0 : index
    %12 = vector.load %arg3[%c1, %c0_12] : memref<5x96xf32, #tpu.memory_space<vmem>>, vector<1x96xf32>
    %c2 = arith.constant 2 : index
    %c0_13 = arith.constant 0 : index
    %13 = vector.load %arg3[%c2, %c0_13] : memref<5x96xf32, #tpu.memory_space<vmem>>, vector<1x96xf32>
    %c3 = arith.constant 3 : index
    %c0_14 = arith.constant 0 : index
    %14 = vector.load %arg3[%c3, %c0_14] : memref<5x96xf32, #tpu.memory_space<vmem>>, vector<1x96xf32>
    %c4 = arith.constant 4 : index
    %c0_15 = arith.constant 0 : index
    %15 = vector.load %arg3[%c4, %c0_15] : memref<5x96xf32, #tpu.memory_space<vmem>>, vector<1x96xf32>
    %16 = vector.extract_strided_slice %15 {offsets = [0, 0], sizes = [1, 32], strides = [1, 1]} : vector<1x96xf32> to vector<1x32xf32>
    %c0_16 = arith.constant 0 : index
    %c0_17 = arith.constant 0 : index
    %17 = vector.load %arg4[%c0_16, %c0_17] : memref<64x32xf32, #tpu.memory_space<vmem>>, vector<32x32xf32>
    %c32_18 = arith.constant 32 : index
    %c0_19 = arith.constant 0 : index
    %18 = vector.load %arg4[%c32_18, %c0_19] : memref<64x32xf32, #tpu.memory_space<vmem>>, vector<32x32xf32>
    %19 = tpu.iota {dimensions = array<i32: 1>} : vector<16x16xi32>
    %20 = vector.broadcast %1 : vector<16x1xi32> to vector<16x16xi32>
    %21 = arith.cmpi eq, %19, %20 : vector<16x16xi32>
    %cst = arith.constant 1.000000e+00 : f32
    %cst_20 = arith.constant 0.000000e+00 : f32
    %22 = vector.broadcast %cst : f32 to vector<16x16xf32>
    %23 = vector.broadcast %cst_20 : f32 to vector<16x16xf32>
    %24 = arith.select %21, %22, %23 : vector<16x16xi1>, vector<16x16xf32>
    %cst_21 = arith.constant dense<0.000000e+00> : vector<16x32xf32>
    %25 = tpu.matmul %24, %4, %cst_21 {dimension_numbers = #tpu.dot_dimension_numbers<[1], [0], [0], [1], [0, 0, 1, 1], [], []>} : vector<16x16xf32>, vector<16x32xf32>, vector<16x32xf32> -> vector<16x32xf32>
    %cst_22 = arith.constant dense<0.000000e+00> : vector<16x96xf32>
    %26 = tpu.matmul %25, %6, %cst_22 {dimension_numbers = #tpu.dot_dimension_numbers<[1], [0], [0], [1], [0, 0, 1, 1], [], []>} : vector<16x32xf32>, vector<32x96xf32>, vector<16x96xf32> -> vector<16x96xf32>
    %27 = vector.broadcast %11 : vector<1x96xf32> to vector<16x96xf32>
    %28 = arith.addf %26, %27 : vector<16x96xf32>
    %cst_23 = arith.constant 0.000000e+00 : f32
    %29 = vector.broadcast %cst_23 : f32 to vector<2x32xf32>
    %30 = vector.extract_strided_slice %28 {offsets = [0, 0], sizes = [2, 96], strides = [1, 1]} : vector<16x96xf32> to vector<2x96xf32>
    %cst_24 = arith.constant dense<0.000000e+00> : vector<2x96xf32>
    %31 = tpu.matmul %29, %7, %cst_24 {dimension_numbers = #tpu.dot_dimension_numbers<[1], [0], [0], [1], [0, 0, 1, 1], [], []>} : vector<2x32xf32>, vector<32x96xf32>, vector<2x96xf32> -> vector<2x96xf32>
    %32 = vector.broadcast %12 : vector<1x96xf32> to vector<2x96xf32>
    %33 = arith.addf %31, %32 : vector<2x96xf32>
    %34 = vector.extract_strided_slice %30 {offsets = [0, 0], sizes = [2, 32], strides = [1, 1]} : vector<2x96xf32> to vector<2x32xf32>
    %35 = vector.extract_strided_slice %33 {offsets = [0, 0], sizes = [2, 32], strides = [1, 1]} : vector<2x96xf32> to vector<2x32xf32>
    %36 = arith.addf %34, %35 : vector<2x32xf32>
    %37 = arith.negf %36 : vector<2x32xf32>
    %38 = math.exp %37 : vector<2x32xf32>
    %cst_25 = arith.constant 1.000000e+00 : f32
    %39 = vector.broadcast %cst_25 : f32 to vector<2x32xf32>
    %40 = arith.addf %39, %38 : vector<2x32xf32>
    %41 = arith.divf %39, %40 : vector<2x32xf32>
    %42 = vector.extract_strided_slice %30 {offsets = [0, 32], sizes = [2, 32], strides = [1, 1]} : vector<2x96xf32> to vector<2x32xf32>
    %43 = vector.extract_strided_slice %33 {offsets = [0, 32], sizes = [2, 32], strides = [1, 1]} : vector<2x96xf32> to vector<2x32xf32>
    %44 = arith.addf %42, %43 : vector<2x32xf32>
    %45 = arith.negf %44 : vector<2x32xf32>
    %46 = math.exp %45 : vector<2x32xf32>
    %cst_26 = arith.constant 1.000000e+00 : f32
    %47 = vector.broadcast %cst_26 : f32 to vector<2x32xf32>
    %48 = arith.addf %47, %46 : vector<2x32xf32>
    %49 = arith.divf %47, %48 : vector<2x32xf32>
    %50 = vector.extract_strided_slice %30 {offsets = [0, 64], sizes = [2, 32], strides = [1, 1]} : vector<2x96xf32> to vector<2x32xf32>
    %51 = vector.extract_strided_slice %33 {offsets = [0, 64], sizes = [2, 32], strides = [1, 1]} : vector<2x96xf32> to vector<2x32xf32>
    %52 = arith.mulf %41, %51 : vector<2x32xf32>
    %53 = arith.addf %50, %52 : vector<2x32xf32>
    %54 = math.tanh %53 : vector<2x32xf32>
    %cst_27 = arith.constant 1.000000e+00 : f32
    %55 = vector.broadcast %cst_27 : f32 to vector<2x32xf32>
    %56 = arith.subf %55, %49 : vector<2x32xf32>
    %57 = arith.mulf %56, %54 : vector<2x32xf32>
    %58 = arith.mulf %49, %29 : vector<2x32xf32>
    %59 = arith.addf %57, %58 : vector<2x32xf32>
    %60 = vector.extract_strided_slice %28 {offsets = [2, 0], sizes = [2, 96], strides = [1, 1]} : vector<16x96xf32> to vector<2x96xf32>
    %cst_28 = arith.constant dense<0.000000e+00> : vector<2x96xf32>
    %61 = tpu.matmul %59, %7, %cst_28 {dimension_numbers = #tpu.dot_dimension_numbers<[1], [0], [0], [1], [0, 0, 1, 1], [], []>} : vector<2x32xf32>, vector<32x96xf32>, vector<2x96xf32> -> vector<2x96xf32>
    %62 = vector.broadcast %12 : vector<1x96xf32> to vector<2x96xf32>
    %63 = arith.addf %61, %62 : vector<2x96xf32>
    %64 = vector.extract_strided_slice %60 {offsets = [0, 0], sizes = [2, 32], strides = [1, 1]} : vector<2x96xf32> to vector<2x32xf32>
    %65 = vector.extract_strided_slice %63 {offsets = [0, 0], sizes = [2, 32], strides = [1, 1]} : vector<2x96xf32> to vector<2x32xf32>
    %66 = arith.addf %64, %65 : vector<2x32xf32>
    %67 = arith.negf %66 : vector<2x32xf32>
    %68 = math.exp %67 : vector<2x32xf32>
    %cst_29 = arith.constant 1.000000e+00 : f32
    %69 = vector.broadcast %cst_29 : f32 to vector<2x32xf32>
    %70 = arith.addf %69, %68 : vector<2x32xf32>
    %71 = arith.divf %69, %70 : vector<2x32xf32>
    %72 = vector.extract_strided_slice %60 {offsets = [0, 32], sizes = [2, 32], strides = [1, 1]} : vector<2x96xf32> to vector<2x32xf32>
    %73 = vector.extract_strided_slice %63 {offsets = [0, 32], sizes = [2, 32], strides = [1, 1]} : vector<2x96xf32> to vector<2x32xf32>
    %74 = arith.addf %72, %73 : vector<2x32xf32>
    %75 = arith.negf %74 : vector<2x32xf32>
    %76 = math.exp %75 : vector<2x32xf32>
    %cst_30 = arith.constant 1.000000e+00 : f32
    %77 = vector.broadcast %cst_30 : f32 to vector<2x32xf32>
    %78 = arith.addf %77, %76 : vector<2x32xf32>
    %79 = arith.divf %77, %78 : vector<2x32xf32>
    %80 = vector.extract_strided_slice %60 {offsets = [0, 64], sizes = [2, 32], strides = [1, 1]} : vector<2x96xf32> to vector<2x32xf32>
    %81 = vector.extract_strided_slice %63 {offsets = [0, 64], sizes = [2, 32], strides = [1, 1]} : vector<2x96xf32> to vector<2x32xf32>
    %82 = arith.mulf %71, %81 : vector<2x32xf32>
    %83 = arith.addf %80, %82 : vector<2x32xf32>
    %84 = math.tanh %83 : vector<2x32xf32>
    %cst_31 = arith.constant 1.000000e+00 : f32
    %85 = vector.broadcast %cst_31 : f32 to vector<2x32xf32>
    %86 = arith.subf %85, %79 : vector<2x32xf32>
    %87 = arith.mulf %86, %84 : vector<2x32xf32>
    %88 = arith.mulf %79, %59 : vector<2x32xf32>
    %89 = arith.addf %87, %88 : vector<2x32xf32>
    %90 = vector.extract_strided_slice %28 {offsets = [4, 0], sizes = [2, 96], strides = [1, 1]} : vector<16x96xf32> to vector<2x96xf32>
    %cst_32 = arith.constant dense<0.000000e+00> : vector<2x96xf32>
    %91 = tpu.matmul %89, %7, %cst_32 {dimension_numbers = #tpu.dot_dimension_numbers<[1], [0], [0], [1], [0, 0, 1, 1], [], []>} : vector<2x32xf32>, vector<32x96xf32>, vector<2x96xf32> -> vector<2x96xf32>
    %92 = vector.broadcast %12 : vector<1x96xf32> to vector<2x96xf32>
    %93 = arith.addf %91, %92 : vector<2x96xf32>
    %94 = vector.extract_strided_slice %90 {offsets = [0, 0], sizes = [2, 32], strides = [1, 1]} : vector<2x96xf32> to vector<2x32xf32>
    %95 = vector.extract_strided_slice %93 {offsets = [0, 0], sizes = [2, 32], strides = [1, 1]} : vector<2x96xf32> to vector<2x32xf32>
    %96 = arith.addf %94, %95 : vector<2x32xf32>
    %97 = arith.negf %96 : vector<2x32xf32>
    %98 = math.exp %97 : vector<2x32xf32>
    %cst_33 = arith.constant 1.000000e+00 : f32
    %99 = vector.broadcast %cst_33 : f32 to vector<2x32xf32>
    %100 = arith.addf %99, %98 : vector<2x32xf32>
    %101 = arith.divf %99, %100 : vector<2x32xf32>
    %102 = vector.extract_strided_slice %90 {offsets = [0, 32], sizes = [2, 32], strides = [1, 1]} : vector<2x96xf32> to vector<2x32xf32>
    %103 = vector.extract_strided_slice %93 {offsets = [0, 32], sizes = [2, 32], strides = [1, 1]} : vector<2x96xf32> to vector<2x32xf32>
    %104 = arith.addf %102, %103 : vector<2x32xf32>
    %105 = arith.negf %104 : vector<2x32xf32>
    %106 = math.exp %105 : vector<2x32xf32>
    %cst_34 = arith.constant 1.000000e+00 : f32
    %107 = vector.broadcast %cst_34 : f32 to vector<2x32xf32>
    %108 = arith.addf %107, %106 : vector<2x32xf32>
    %109 = arith.divf %107, %108 : vector<2x32xf32>
    %110 = vector.extract_strided_slice %90 {offsets = [0, 64], sizes = [2, 32], strides = [1, 1]} : vector<2x96xf32> to vector<2x32xf32>
    %111 = vector.extract_strided_slice %93 {offsets = [0, 64], sizes = [2, 32], strides = [1, 1]} : vector<2x96xf32> to vector<2x32xf32>
    %112 = arith.mulf %101, %111 : vector<2x32xf32>
    %113 = arith.addf %110, %112 : vector<2x32xf32>
    %114 = math.tanh %113 : vector<2x32xf32>
    %cst_35 = arith.constant 1.000000e+00 : f32
    %115 = vector.broadcast %cst_35 : f32 to vector<2x32xf32>
    %116 = arith.subf %115, %109 : vector<2x32xf32>
    %117 = arith.mulf %116, %114 : vector<2x32xf32>
    %118 = arith.mulf %109, %89 : vector<2x32xf32>
    %119 = arith.addf %117, %118 : vector<2x32xf32>
    %120 = vector.extract_strided_slice %28 {offsets = [6, 0], sizes = [2, 96], strides = [1, 1]} : vector<16x96xf32> to vector<2x96xf32>
    %cst_36 = arith.constant dense<0.000000e+00> : vector<2x96xf32>
    %121 = tpu.matmul %119, %7, %cst_36 {dimension_numbers = #tpu.dot_dimension_numbers<[1], [0], [0], [1], [0, 0, 1, 1], [], []>} : vector<2x32xf32>, vector<32x96xf32>, vector<2x96xf32> -> vector<2x96xf32>
    %122 = vector.broadcast %12 : vector<1x96xf32> to vector<2x96xf32>
    %123 = arith.addf %121, %122 : vector<2x96xf32>
    %124 = vector.extract_strided_slice %120 {offsets = [0, 0], sizes = [2, 32], strides = [1, 1]} : vector<2x96xf32> to vector<2x32xf32>
    %125 = vector.extract_strided_slice %123 {offsets = [0, 0], sizes = [2, 32], strides = [1, 1]} : vector<2x96xf32> to vector<2x32xf32>
    %126 = arith.addf %124, %125 : vector<2x32xf32>
    %127 = arith.negf %126 : vector<2x32xf32>
    %128 = math.exp %127 : vector<2x32xf32>
    %cst_37 = arith.constant 1.000000e+00 : f32
    %129 = vector.broadcast %cst_37 : f32 to vector<2x32xf32>
    %130 = arith.addf %129, %128 : vector<2x32xf32>
    %131 = arith.divf %129, %130 : vector<2x32xf32>
    %132 = vector.extract_strided_slice %120 {offsets = [0, 32], sizes = [2, 32], strides = [1, 1]} : vector<2x96xf32> to vector<2x32xf32>
    %133 = vector.extract_strided_slice %123 {offsets = [0, 32], sizes = [2, 32], strides = [1, 1]} : vector<2x96xf32> to vector<2x32xf32>
    %134 = arith.addf %132, %133 : vector<2x32xf32>
    %135 = arith.negf %134 : vector<2x32xf32>
    %136 = math.exp %135 : vector<2x32xf32>
    %cst_38 = arith.constant 1.000000e+00 : f32
    %137 = vector.broadcast %cst_38 : f32 to vector<2x32xf32>
    %138 = arith.addf %137, %136 : vector<2x32xf32>
    %139 = arith.divf %137, %138 : vector<2x32xf32>
    %140 = vector.extract_strided_slice %120 {offsets = [0, 64], sizes = [2, 32], strides = [1, 1]} : vector<2x96xf32> to vector<2x32xf32>
    %141 = vector.extract_strided_slice %123 {offsets = [0, 64], sizes = [2, 32], strides = [1, 1]} : vector<2x96xf32> to vector<2x32xf32>
    %142 = arith.mulf %131, %141 : vector<2x32xf32>
    %143 = arith.addf %140, %142 : vector<2x32xf32>
    %144 = math.tanh %143 : vector<2x32xf32>
    %cst_39 = arith.constant 1.000000e+00 : f32
    %145 = vector.broadcast %cst_39 : f32 to vector<2x32xf32>
    %146 = arith.subf %145, %139 : vector<2x32xf32>
    %147 = arith.mulf %146, %144 : vector<2x32xf32>
    %148 = arith.mulf %139, %119 : vector<2x32xf32>
    %149 = arith.addf %147, %148 : vector<2x32xf32>
    %150 = vector.extract_strided_slice %28 {offsets = [8, 0], sizes = [2, 96], strides = [1, 1]} : vector<16x96xf32> to vector<2x96xf32>
    %cst_40 = arith.constant dense<0.000000e+00> : vector<2x96xf32>
    %151 = tpu.matmul %149, %7, %cst_40 {dimension_numbers = #tpu.dot_dimension_numbers<[1], [0], [0], [1], [0, 0, 1, 1], [], []>} : vector<2x32xf32>, vector<32x96xf32>, vector<2x96xf32> -> vector<2x96xf32>
    %152 = vector.broadcast %12 : vector<1x96xf32> to vector<2x96xf32>
    %153 = arith.addf %151, %152 : vector<2x96xf32>
    %154 = vector.extract_strided_slice %150 {offsets = [0, 0], sizes = [2, 32], strides = [1, 1]} : vector<2x96xf32> to vector<2x32xf32>
    %155 = vector.extract_strided_slice %153 {offsets = [0, 0], sizes = [2, 32], strides = [1, 1]} : vector<2x96xf32> to vector<2x32xf32>
    %156 = arith.addf %154, %155 : vector<2x32xf32>
    %157 = arith.negf %156 : vector<2x32xf32>
    %158 = math.exp %157 : vector<2x32xf32>
    %cst_41 = arith.constant 1.000000e+00 : f32
    %159 = vector.broadcast %cst_41 : f32 to vector<2x32xf32>
    %160 = arith.addf %159, %158 : vector<2x32xf32>
    %161 = arith.divf %159, %160 : vector<2x32xf32>
    %162 = vector.extract_strided_slice %150 {offsets = [0, 32], sizes = [2, 32], strides = [1, 1]} : vector<2x96xf32> to vector<2x32xf32>
    %163 = vector.extract_strided_slice %153 {offsets = [0, 32], sizes = [2, 32], strides = [1, 1]} : vector<2x96xf32> to vector<2x32xf32>
    %164 = arith.addf %162, %163 : vector<2x32xf32>
    %165 = arith.negf %164 : vector<2x32xf32>
    %166 = math.exp %165 : vector<2x32xf32>
    %cst_42 = arith.constant 1.000000e+00 : f32
    %167 = vector.broadcast %cst_42 : f32 to vector<2x32xf32>
    %168 = arith.addf %167, %166 : vector<2x32xf32>
    %169 = arith.divf %167, %168 : vector<2x32xf32>
    %170 = vector.extract_strided_slice %150 {offsets = [0, 64], sizes = [2, 32], strides = [1, 1]} : vector<2x96xf32> to vector<2x32xf32>
    %171 = vector.extract_strided_slice %153 {offsets = [0, 64], sizes = [2, 32], strides = [1, 1]} : vector<2x96xf32> to vector<2x32xf32>
    %172 = arith.mulf %161, %171 : vector<2x32xf32>
    %173 = arith.addf %170, %172 : vector<2x32xf32>
    %174 = math.tanh %173 : vector<2x32xf32>
    %cst_43 = arith.constant 1.000000e+00 : f32
    %175 = vector.broadcast %cst_43 : f32 to vector<2x32xf32>
    %176 = arith.subf %175, %169 : vector<2x32xf32>
    %177 = arith.mulf %176, %174 : vector<2x32xf32>
    %178 = arith.mulf %169, %149 : vector<2x32xf32>
    %179 = arith.addf %177, %178 : vector<2x32xf32>
    %180 = vector.extract_strided_slice %28 {offsets = [10, 0], sizes = [2, 96], strides = [1, 1]} : vector<16x96xf32> to vector<2x96xf32>
    %cst_44 = arith.constant dense<0.000000e+00> : vector<2x96xf32>
    %181 = tpu.matmul %179, %7, %cst_44 {dimension_numbers = #tpu.dot_dimension_numbers<[1], [0], [0], [1], [0, 0, 1, 1], [], []>} : vector<2x32xf32>, vector<32x96xf32>, vector<2x96xf32> -> vector<2x96xf32>
    %182 = vector.broadcast %12 : vector<1x96xf32> to vector<2x96xf32>
    %183 = arith.addf %181, %182 : vector<2x96xf32>
    %184 = vector.extract_strided_slice %180 {offsets = [0, 0], sizes = [2, 32], strides = [1, 1]} : vector<2x96xf32> to vector<2x32xf32>
    %185 = vector.extract_strided_slice %183 {offsets = [0, 0], sizes = [2, 32], strides = [1, 1]} : vector<2x96xf32> to vector<2x32xf32>
    %186 = arith.addf %184, %185 : vector<2x32xf32>
    %187 = arith.negf %186 : vector<2x32xf32>
    %188 = math.exp %187 : vector<2x32xf32>
    %cst_45 = arith.constant 1.000000e+00 : f32
    %189 = vector.broadcast %cst_45 : f32 to vector<2x32xf32>
    %190 = arith.addf %189, %188 : vector<2x32xf32>
    %191 = arith.divf %189, %190 : vector<2x32xf32>
    %192 = vector.extract_strided_slice %180 {offsets = [0, 32], sizes = [2, 32], strides = [1, 1]} : vector<2x96xf32> to vector<2x32xf32>
    %193 = vector.extract_strided_slice %183 {offsets = [0, 32], sizes = [2, 32], strides = [1, 1]} : vector<2x96xf32> to vector<2x32xf32>
    %194 = arith.addf %192, %193 : vector<2x32xf32>
    %195 = arith.negf %194 : vector<2x32xf32>
    %196 = math.exp %195 : vector<2x32xf32>
    %cst_46 = arith.constant 1.000000e+00 : f32
    %197 = vector.broadcast %cst_46 : f32 to vector<2x32xf32>
    %198 = arith.addf %197, %196 : vector<2x32xf32>
    %199 = arith.divf %197, %198 : vector<2x32xf32>
    %200 = vector.extract_strided_slice %180 {offsets = [0, 64], sizes = [2, 32], strides = [1, 1]} : vector<2x96xf32> to vector<2x32xf32>
    %201 = vector.extract_strided_slice %183 {offsets = [0, 64], sizes = [2, 32], strides = [1, 1]} : vector<2x96xf32> to vector<2x32xf32>
    %202 = arith.mulf %191, %201 : vector<2x32xf32>
    %203 = arith.addf %200, %202 : vector<2x32xf32>
    %204 = math.tanh %203 : vector<2x32xf32>
    %cst_47 = arith.constant 1.000000e+00 : f32
    %205 = vector.broadcast %cst_47 : f32 to vector<2x32xf32>
    %206 = arith.subf %205, %199 : vector<2x32xf32>
    %207 = arith.mulf %206, %204 : vector<2x32xf32>
    %208 = arith.mulf %199, %179 : vector<2x32xf32>
    %209 = arith.addf %207, %208 : vector<2x32xf32>
    %210 = vector.extract_strided_slice %28 {offsets = [12, 0], sizes = [2, 96], strides = [1, 1]} : vector<16x96xf32> to vector<2x96xf32>
    %cst_48 = arith.constant dense<0.000000e+00> : vector<2x96xf32>
    %211 = tpu.matmul %209, %7, %cst_48 {dimension_numbers = #tpu.dot_dimension_numbers<[1], [0], [0], [1], [0, 0, 1, 1], [], []>} : vector<2x32xf32>, vector<32x96xf32>, vector<2x96xf32> -> vector<2x96xf32>
    %212 = vector.broadcast %12 : vector<1x96xf32> to vector<2x96xf32>
    %213 = arith.addf %211, %212 : vector<2x96xf32>
    %214 = vector.extract_strided_slice %210 {offsets = [0, 0], sizes = [2, 32], strides = [1, 1]} : vector<2x96xf32> to vector<2x32xf32>
    %215 = vector.extract_strided_slice %213 {offsets = [0, 0], sizes = [2, 32], strides = [1, 1]} : vector<2x96xf32> to vector<2x32xf32>
    %216 = arith.addf %214, %215 : vector<2x32xf32>
    %217 = arith.negf %216 : vector<2x32xf32>
    %218 = math.exp %217 : vector<2x32xf32>
    %cst_49 = arith.constant 1.000000e+00 : f32
    %219 = vector.broadcast %cst_49 : f32 to vector<2x32xf32>
    %220 = arith.addf %219, %218 : vector<2x32xf32>
    %221 = arith.divf %219, %220 : vector<2x32xf32>
    %222 = vector.extract_strided_slice %210 {offsets = [0, 32], sizes = [2, 32], strides = [1, 1]} : vector<2x96xf32> to vector<2x32xf32>
    %223 = vector.extract_strided_slice %213 {offsets = [0, 32], sizes = [2, 32], strides = [1, 1]} : vector<2x96xf32> to vector<2x32xf32>
    %224 = arith.addf %222, %223 : vector<2x32xf32>
    %225 = arith.negf %224 : vector<2x32xf32>
    %226 = math.exp %225 : vector<2x32xf32>
    %cst_50 = arith.constant 1.000000e+00 : f32
    %227 = vector.broadcast %cst_50 : f32 to vector<2x32xf32>
    %228 = arith.addf %227, %226 : vector<2x32xf32>
    %229 = arith.divf %227, %228 : vector<2x32xf32>
    %230 = vector.extract_strided_slice %210 {offsets = [0, 64], sizes = [2, 32], strides = [1, 1]} : vector<2x96xf32> to vector<2x32xf32>
    %231 = vector.extract_strided_slice %213 {offsets = [0, 64], sizes = [2, 32], strides = [1, 1]} : vector<2x96xf32> to vector<2x32xf32>
    %232 = arith.mulf %221, %231 : vector<2x32xf32>
    %233 = arith.addf %230, %232 : vector<2x32xf32>
    %234 = math.tanh %233 : vector<2x32xf32>
    %cst_51 = arith.constant 1.000000e+00 : f32
    %235 = vector.broadcast %cst_51 : f32 to vector<2x32xf32>
    %236 = arith.subf %235, %229 : vector<2x32xf32>
    %237 = arith.mulf %236, %234 : vector<2x32xf32>
    %238 = arith.mulf %229, %209 : vector<2x32xf32>
    %239 = arith.addf %237, %238 : vector<2x32xf32>
    %240 = vector.extract_strided_slice %28 {offsets = [14, 0], sizes = [2, 96], strides = [1, 1]} : vector<16x96xf32> to vector<2x96xf32>
    %cst_52 = arith.constant dense<0.000000e+00> : vector<2x96xf32>
    %241 = tpu.matmul %239, %7, %cst_52 {dimension_numbers = #tpu.dot_dimension_numbers<[1], [0], [0], [1], [0, 0, 1, 1], [], []>} : vector<2x32xf32>, vector<32x96xf32>, vector<2x96xf32> -> vector<2x96xf32>
    %242 = vector.broadcast %12 : vector<1x96xf32> to vector<2x96xf32>
    %243 = arith.addf %241, %242 : vector<2x96xf32>
    %244 = vector.extract_strided_slice %240 {offsets = [0, 0], sizes = [2, 32], strides = [1, 1]} : vector<2x96xf32> to vector<2x32xf32>
    %245 = vector.extract_strided_slice %243 {offsets = [0, 0], sizes = [2, 32], strides = [1, 1]} : vector<2x96xf32> to vector<2x32xf32>
    %246 = arith.addf %244, %245 : vector<2x32xf32>
    %247 = arith.negf %246 : vector<2x32xf32>
    %248 = math.exp %247 : vector<2x32xf32>
    %cst_53 = arith.constant 1.000000e+00 : f32
    %249 = vector.broadcast %cst_53 : f32 to vector<2x32xf32>
    %250 = arith.addf %249, %248 : vector<2x32xf32>
    %251 = arith.divf %249, %250 : vector<2x32xf32>
    %252 = vector.extract_strided_slice %240 {offsets = [0, 32], sizes = [2, 32], strides = [1, 1]} : vector<2x96xf32> to vector<2x32xf32>
    %253 = vector.extract_strided_slice %243 {offsets = [0, 32], sizes = [2, 32], strides = [1, 1]} : vector<2x96xf32> to vector<2x32xf32>
    %254 = arith.addf %252, %253 : vector<2x32xf32>
    %255 = arith.negf %254 : vector<2x32xf32>
    %256 = math.exp %255 : vector<2x32xf32>
    %cst_54 = arith.constant 1.000000e+00 : f32
    %257 = vector.broadcast %cst_54 : f32 to vector<2x32xf32>
    %258 = arith.addf %257, %256 : vector<2x32xf32>
    %259 = arith.divf %257, %258 : vector<2x32xf32>
    %260 = vector.extract_strided_slice %240 {offsets = [0, 64], sizes = [2, 32], strides = [1, 1]} : vector<2x96xf32> to vector<2x32xf32>
    %261 = vector.extract_strided_slice %243 {offsets = [0, 64], sizes = [2, 32], strides = [1, 1]} : vector<2x96xf32> to vector<2x32xf32>
    %262 = arith.mulf %251, %261 : vector<2x32xf32>
    %263 = arith.addf %260, %262 : vector<2x32xf32>
    %264 = math.tanh %263 : vector<2x32xf32>
    %cst_55 = arith.constant 1.000000e+00 : f32
    %265 = vector.broadcast %cst_55 : f32 to vector<2x32xf32>
    %266 = arith.subf %265, %259 : vector<2x32xf32>
    %267 = arith.mulf %266, %264 : vector<2x32xf32>
    %268 = arith.mulf %259, %239 : vector<2x32xf32>
    %269 = arith.addf %267, %268 : vector<2x32xf32>
    %270 = arith.mulf %59, %269 : vector<2x32xf32>
    %cst_56 = arith.constant dense<0.000000e+00> : vector<2xf32>
    %271 = vector.multi_reduction <add>, %270, %cst_56 [1] : vector<2x32xf32> to vector<2xf32>
    %272 = vector.shape_cast %271 : vector<2xf32> to vector<2x1xf32>
    %273 = arith.mulf %89, %269 : vector<2x32xf32>
    %cst_57 = arith.constant dense<0.000000e+00> : vector<2xf32>
    %274 = vector.multi_reduction <add>, %273, %cst_57 [1] : vector<2x32xf32> to vector<2xf32>
    %275 = vector.shape_cast %274 : vector<2xf32> to vector<2x1xf32>
    %276 = arith.mulf %119, %269 : vector<2x32xf32>
    %cst_58 = arith.constant dense<0.000000e+00> : vector<2xf32>
    %277 = vector.multi_reduction <add>, %276, %cst_58 [1] : vector<2x32xf32> to vector<2xf32>
    %278 = vector.shape_cast %277 : vector<2xf32> to vector<2x1xf32>
    %279 = arith.mulf %149, %269 : vector<2x32xf32>
    %cst_59 = arith.constant dense<0.000000e+00> : vector<2xf32>
    %280 = vector.multi_reduction <add>, %279, %cst_59 [1] : vector<2x32xf32> to vector<2xf32>
    %281 = vector.shape_cast %280 : vector<2xf32> to vector<2x1xf32>
    %282 = arith.mulf %179, %269 : vector<2x32xf32>
    %cst_60 = arith.constant dense<0.000000e+00> : vector<2xf32>
    %283 = vector.multi_reduction <add>, %282, %cst_60 [1] : vector<2x32xf32> to vector<2xf32>
    %284 = vector.shape_cast %283 : vector<2xf32> to vector<2x1xf32>
    %285 = arith.mulf %209, %269 : vector<2x32xf32>
    %cst_61 = arith.constant dense<0.000000e+00> : vector<2xf32>
    %286 = vector.multi_reduction <add>, %285, %cst_61 [1] : vector<2x32xf32> to vector<2xf32>
    %287 = vector.shape_cast %286 : vector<2xf32> to vector<2x1xf32>
    %288 = arith.mulf %239, %269 : vector<2x32xf32>
    %cst_62 = arith.constant dense<0.000000e+00> : vector<2xf32>
    %289 = vector.multi_reduction <add>, %288, %cst_62 [1] : vector<2x32xf32> to vector<2xf32>
    %290 = vector.shape_cast %289 : vector<2xf32> to vector<2x1xf32>
    %291 = arith.mulf %269, %269 : vector<2x32xf32>
    %cst_63 = arith.constant dense<0.000000e+00> : vector<2xf32>
    %292 = vector.multi_reduction <add>, %291, %cst_63 [1] : vector<2x32xf32> to vector<2xf32>
    %293 = vector.shape_cast %292 : vector<2xf32> to vector<2x1xf32>
    %294 = arith.maximumf %272, %275 : vector<2x1xf32>
    %295 = arith.maximumf %294, %278 : vector<2x1xf32>
    %296 = arith.maximumf %295, %281 : vector<2x1xf32>
    %297 = arith.maximumf %296, %284 : vector<2x1xf32>
    %298 = arith.maximumf %297, %287 : vector<2x1xf32>
    %299 = arith.maximumf %298, %290 : vector<2x1xf32>
    %300 = arith.maximumf %299, %293 : vector<2x1xf32>
    %301 = arith.subf %272, %300 : vector<2x1xf32>
    %302 = math.exp %301 : vector<2x1xf32>
    %303 = arith.subf %275, %300 : vector<2x1xf32>
    %304 = math.exp %303 : vector<2x1xf32>
    %305 = arith.subf %278, %300 : vector<2x1xf32>
    %306 = math.exp %305 : vector<2x1xf32>
    %307 = arith.subf %281, %300 : vector<2x1xf32>
    %308 = math.exp %307 : vector<2x1xf32>
    %309 = arith.subf %284, %300 : vector<2x1xf32>
    %310 = math.exp %309 : vector<2x1xf32>
    %311 = arith.subf %287, %300 : vector<2x1xf32>
    %312 = math.exp %311 : vector<2x1xf32>
    %313 = arith.subf %290, %300 : vector<2x1xf32>
    %314 = math.exp %313 : vector<2x1xf32>
    %315 = arith.subf %293, %300 : vector<2x1xf32>
    %316 = math.exp %315 : vector<2x1xf32>
    %317 = arith.addf %302, %304 : vector<2x1xf32>
    %318 = arith.addf %317, %306 : vector<2x1xf32>
    %319 = arith.addf %318, %308 : vector<2x1xf32>
    %320 = arith.addf %319, %310 : vector<2x1xf32>
    %321 = arith.addf %320, %312 : vector<2x1xf32>
    %322 = arith.addf %321, %314 : vector<2x1xf32>
    %323 = arith.addf %322, %316 : vector<2x1xf32>
    %324 = vector.broadcast %302 : vector<2x1xf32> to vector<2x32xf32>
    %325 = arith.mulf %324, %59 : vector<2x32xf32>
    %326 = vector.broadcast %304 : vector<2x1xf32> to vector<2x32xf32>
    %327 = arith.mulf %326, %89 : vector<2x32xf32>
    %328 = arith.addf %325, %327 : vector<2x32xf32>
    %329 = vector.broadcast %306 : vector<2x1xf32> to vector<2x32xf32>
    %330 = arith.mulf %329, %119 : vector<2x32xf32>
    %331 = arith.addf %328, %330 : vector<2x32xf32>
    %332 = vector.broadcast %308 : vector<2x1xf32> to vector<2x32xf32>
    %333 = arith.mulf %332, %149 : vector<2x32xf32>
    %334 = arith.addf %331, %333 : vector<2x32xf32>
    %335 = vector.broadcast %310 : vector<2x1xf32> to vector<2x32xf32>
    %336 = arith.mulf %335, %179 : vector<2x32xf32>
    %337 = arith.addf %334, %336 : vector<2x32xf32>
    %338 = vector.broadcast %312 : vector<2x1xf32> to vector<2x32xf32>
    %339 = arith.mulf %338, %209 : vector<2x32xf32>
    %340 = arith.addf %337, %339 : vector<2x32xf32>
    %341 = vector.broadcast %314 : vector<2x1xf32> to vector<2x32xf32>
    %342 = arith.mulf %341, %239 : vector<2x32xf32>
    %343 = arith.addf %340, %342 : vector<2x32xf32>
    %344 = vector.broadcast %316 : vector<2x1xf32> to vector<2x32xf32>
    %345 = arith.mulf %344, %269 : vector<2x32xf32>
    %346 = arith.addf %343, %345 : vector<2x32xf32>
    %347 = vector.broadcast %323 : vector<2x1xf32> to vector<2x32xf32>
    %348 = arith.divf %346, %347 : vector<2x32xf32>
    %349 = tpu.iota {dimensions = array<i32: 1>} : vector<16x32xi32>
    %350 = vector.broadcast %2 : vector<16x1xi32> to vector<16x32xi32>
    %351 = arith.cmpi eq, %349, %350 : vector<16x32xi32>
    %cst_64 = arith.constant 1.000000e+00 : f32
    %cst_65 = arith.constant 0.000000e+00 : f32
    %352 = vector.broadcast %cst_64 : f32 to vector<16x32xf32>
    %353 = vector.broadcast %cst_65 : f32 to vector<16x32xf32>
    %354 = arith.select %351, %352, %353 : vector<16x32xi1>, vector<16x32xf32>
    %cst_66 = arith.constant dense<0.000000e+00> : vector<16x32xf32>
    %355 = tpu.matmul %354, %5, %cst_66 {dimension_numbers = #tpu.dot_dimension_numbers<[1], [0], [0], [1], [0, 0, 1, 1], [], []>} : vector<16x32xf32>, vector<32x32xf32>, vector<16x32xf32> -> vector<16x32xf32>
    %356 = tpu.iota {dimensions = array<i32: 0>} : vector<16x2xi32>
    %c2_i32 = arith.constant 2 : i32
    %c0_i32 = arith.constant 0 : i32
    %357 = arith.cmpi eq, %c2_i32, %c0_i32 : i32
    %c1_i32 = arith.constant 1 : i32
    %358 = arith.select %357, %c1_i32, %c2_i32 : i32
    %359 = vector.broadcast %358 : i32 to vector<16x2xi32>
    %360 = arith.remsi %356, %359 : vector<16x2xi32>
    %c0_i32_67 = arith.constant 0 : i32
    %361 = vector.broadcast %c0_i32_67 : i32 to vector<16x2xi32>
    %362 = arith.cmpi ne, %360, %361 : vector<16x2xi32>
    %c0_i32_68 = arith.constant 0 : i32
    %363 = vector.broadcast %c0_i32_68 : i32 to vector<16x2xi32>
    %364 = arith.cmpi slt, %360, %363 : vector<16x2xi32>
    %c0_i32_69 = arith.constant 0 : i32
    %365 = arith.cmpi slt, %358, %c0_i32_69 : i32
    %366 = vector.broadcast %365 : i1 to vector<16x2xi1>
    %367 = vector.broadcast %366 : vector<16x2xi1> to vector<16x2xi1>
    %368 = arith.xori %364, %367 : vector<16x2xi1>
    %369 = arith.andi %368, %362 : vector<16x2xi1>
    %370 = vector.broadcast %358 : i32 to vector<16x2xi32>
    %371 = arith.addi %360, %370 : vector<16x2xi32>
    %372 = arith.select %369, %371, %360 : vector<16x2xi1>, vector<16x2xi32>
    %373 = tpu.iota {dimensions = array<i32: 1>} : vector<16x2xi32>
    %374 = arith.cmpi eq, %372, %373 : vector<16x2xi32>
    %cst_70 = arith.constant 1.000000e+00 : f32
    %cst_71 = arith.constant 0.000000e+00 : f32
    %375 = vector.broadcast %cst_70 : f32 to vector<16x2xf32>
    %376 = vector.broadcast %cst_71 : f32 to vector<16x2xf32>
    %377 = arith.select %374, %375, %376 : vector<16x2xi1>, vector<16x2xf32>
    %cst_72 = arith.constant dense<0.000000e+00> : vector<2x96xf32>
    %378 = tpu.matmul %348, %9, %cst_72 {dimension_numbers = #tpu.dot_dimension_numbers<[1], [0], [0], [1], [0, 0, 1, 1], [], []>} : vector<2x32xf32>, vector<32x96xf32>, vector<2x96xf32> -> vector<2x96xf32>
    %379 = vector.broadcast %13 : vector<1x96xf32> to vector<2x96xf32>
    %380 = arith.addf %378, %379 : vector<2x96xf32>
    %cst_73 = arith.constant dense<0.000000e+00> : vector<2x96xf32>
    %381 = tpu.matmul %269, %10, %cst_73 {dimension_numbers = #tpu.dot_dimension_numbers<[1], [0], [0], [1], [0, 0, 1, 1], [], []>} : vector<2x32xf32>, vector<32x96xf32>, vector<2x96xf32> -> vector<2x96xf32>
    %382 = vector.broadcast %14 : vector<1x96xf32> to vector<2x96xf32>
    %383 = arith.addf %381, %382 : vector<2x96xf32>
    %cst_74 = arith.constant dense<0.000000e+00> : vector<16x96xf32>
    %384 = tpu.matmul %355, %8, %cst_74 {dimension_numbers = #tpu.dot_dimension_numbers<[1], [0], [0], [1], [0, 0, 1, 1], [], []>} : vector<16x32xf32>, vector<32x96xf32>, vector<16x96xf32> -> vector<16x96xf32>
    %cst_75 = arith.constant dense<0.000000e+00> : vector<16x96xf32>
    %385 = tpu.matmul %377, %380, %cst_75 {dimension_numbers = #tpu.dot_dimension_numbers<[1], [0], [0], [1], [0, 0, 1, 1], [], []>} : vector<16x2xf32>, vector<2x96xf32>, vector<16x96xf32> -> vector<16x96xf32>
    %386 = arith.addf %384, %385 : vector<16x96xf32>
    %cst_76 = arith.constant dense<0.000000e+00> : vector<16x96xf32>
    %387 = tpu.matmul %377, %383, %cst_76 {dimension_numbers = #tpu.dot_dimension_numbers<[1], [0], [0], [1], [0, 0, 1, 1], [], []>} : vector<16x2xf32>, vector<2x96xf32>, vector<16x96xf32> -> vector<16x96xf32>
    %cst_77 = arith.constant dense<0.000000e+00> : vector<16x32xf32>
    %388 = tpu.matmul %377, %269, %cst_77 {dimension_numbers = #tpu.dot_dimension_numbers<[1], [0], [0], [1], [0, 0, 1, 1], [], []>} : vector<16x2xf32>, vector<2x32xf32>, vector<16x32xf32> -> vector<16x32xf32>
    %389 = vector.extract_strided_slice %386 {offsets = [0, 0], sizes = [16, 32], strides = [1, 1]} : vector<16x96xf32> to vector<16x32xf32>
    %390 = vector.extract_strided_slice %387 {offsets = [0, 0], sizes = [16, 32], strides = [1, 1]} : vector<16x96xf32> to vector<16x32xf32>
    %391 = arith.addf %389, %390 : vector<16x32xf32>
    %392 = arith.negf %391 : vector<16x32xf32>
    %393 = math.exp %392 : vector<16x32xf32>
    %cst_78 = arith.constant 1.000000e+00 : f32
    %394 = vector.broadcast %cst_78 : f32 to vector<16x32xf32>
    %395 = arith.addf %394, %393 : vector<16x32xf32>
    %396 = arith.divf %394, %395 : vector<16x32xf32>
    %397 = vector.extract_strided_slice %386 {offsets = [0, 32], sizes = [16, 32], strides = [1, 1]} : vector<16x96xf32> to vector<16x32xf32>
    %398 = vector.extract_strided_slice %387 {offsets = [0, 32], sizes = [16, 32], strides = [1, 1]} : vector<16x96xf32> to vector<16x32xf32>
    %399 = arith.addf %397, %398 : vector<16x32xf32>
    %400 = arith.negf %399 : vector<16x32xf32>
    %401 = math.exp %400 : vector<16x32xf32>
    %cst_79 = arith.constant 1.000000e+00 : f32
    %402 = vector.broadcast %cst_79 : f32 to vector<16x32xf32>
    %403 = arith.addf %402, %401 : vector<16x32xf32>
    %404 = arith.divf %402, %403 : vector<16x32xf32>
    %405 = vector.extract_strided_slice %386 {offsets = [0, 64], sizes = [16, 32], strides = [1, 1]} : vector<16x96xf32> to vector<16x32xf32>
    %406 = vector.extract_strided_slice %387 {offsets = [0, 64], sizes = [16, 32], strides = [1, 1]} : vector<16x96xf32> to vector<16x32xf32>
    %407 = arith.mulf %396, %406 : vector<16x32xf32>
    %408 = arith.addf %405, %407 : vector<16x32xf32>
    %409 = math.tanh %408 : vector<16x32xf32>
    %cst_80 = arith.constant 1.000000e+00 : f32
    %410 = vector.broadcast %cst_80 : f32 to vector<16x32xf32>
    %411 = arith.subf %410, %404 : vector<16x32xf32>
    %412 = arith.mulf %411, %409 : vector<16x32xf32>
    %413 = arith.mulf %404, %388 : vector<16x32xf32>
    %414 = arith.addf %412, %413 : vector<16x32xf32>
    %cst_81 = arith.constant dense<0.000000e+00> : vector<2x32xf32>
    %415 = tpu.matmul %348, %18, %cst_81 {dimension_numbers = #tpu.dot_dimension_numbers<[1], [0], [0], [1], [0, 0, 1, 1], [], []>} : vector<2x32xf32>, vector<32x32xf32>, vector<2x32xf32> -> vector<2x32xf32>
    %416 = vector.broadcast %16 : vector<1x32xf32> to vector<2x32xf32>
    %417 = arith.addf %415, %416 : vector<2x32xf32>
    %cst_82 = arith.constant dense<0.000000e+00> : vector<16x32xf32>
    %418 = tpu.matmul %414, %17, %cst_82 {dimension_numbers = #tpu.dot_dimension_numbers<[1], [0], [0], [1], [0, 0, 1, 1], [], []>} : vector<16x32xf32>, vector<32x32xf32>, vector<16x32xf32> -> vector<16x32xf32>
    %cst_83 = arith.constant dense<0.000000e+00> : vector<16x32xf32>
    %419 = tpu.matmul %377, %417, %cst_83 {dimension_numbers = #tpu.dot_dimension_numbers<[1], [0], [0], [1], [0, 0, 1, 1], [], []>} : vector<16x2xf32>, vector<2x32xf32>, vector<16x32xf32> -> vector<16x32xf32>
    %420 = arith.addf %418, %419 : vector<16x32xf32>
    %cst_84 = arith.constant dense<0xFF800000> : vector<16xf32>
    %421 = vector.multi_reduction <maximumf>, %420, %cst_84 [1] : vector<16x32xf32> to vector<16xf32>
    %422 = vector.shape_cast %421 : vector<16xf32> to vector<16x1xf32>
    %423 = vector.broadcast %422 : vector<16x1xf32> to vector<16x32xf32>
    %424 = arith.subf %420, %423 : vector<16x32xf32>
    %425 = math.exp %424 : vector<16x32xf32>
    %cst_85 = arith.constant dense<0.000000e+00> : vector<16xf32>
    %426 = vector.multi_reduction <add>, %425, %cst_85 [1] : vector<16x32xf32> to vector<16xf32>
    %427 = vector.shape_cast %426 : vector<16xf32> to vector<16x1xf32>
    %428 = math.log %427 : vector<16x1xf32>
    %429 = arith.addf %422, %428 : vector<16x1xf32>
    %430 = tpu.iota {dimensions = array<i32: 1>} : vector<16x32xi32>
    %431 = vector.broadcast %3 : vector<16x1xi32> to vector<16x32xi32>
    %432 = arith.cmpi eq, %430, %431 : vector<16x32xi32>
    %cst_86 = arith.constant 0.000000e+00 : f32
    %433 = vector.broadcast %cst_86 : f32 to vector<16x32xf32>
    %434 = arith.select %432, %420, %433 : vector<16x32xi1>, vector<16x32xf32>
    %cst_87 = arith.constant dense<0.000000e+00> : vector<16xf32>
    %435 = vector.multi_reduction <add>, %434, %cst_87 [1] : vector<16x32xf32> to vector<16xf32>
    %436 = vector.shape_cast %435 : vector<16xf32> to vector<16x1xf32>
    %437 = arith.subf %429, %436 : vector<16x1xf32>
    %438 = vector.shape_cast %437 : vector<16x1xf32> to vector<1x16x1xf32>
    %cst_88 = arith.constant dense<0.000000e+00> : vector<1xf32>
    %439 = vector.multi_reduction <add>, %438, %cst_88 [1, 2] : vector<1x16x1xf32> to vector<1xf32>
    %440 = vector.shape_cast %439 : vector<1xf32> to vector<1x1x1xf32>
    %441 = vector.extract %440[0, 0, 0] : f32 from vector<1x1x1xf32>
    %cst_89 = arith.constant 1.600000e+01 : f32
    %442 = arith.divf %441, %cst_89 : f32
    %443 = vector.broadcast %442 : f32 to vector<1x1xf32>
    %c0_90 = arith.constant 0 : index
    %c0_91 = arith.constant 0 : index
    %444 = vector.load %arg5[%c0_90, %c0_91] : memref<1x1xf32, #tpu.memory_space<vmem>>, vector<1x1xf32>
    tpu.vector_store %arg5[%c0_90, %c0_91], %443 {strides = array<i32>} : memref<1x1xf32, #tpu.memory_space<vmem>>, vector<1x1xf32>,
    return
  }
}

</mosaic_0001>

<bundles_post_ra>
// kernel: seq2seq_attention_loss.1
= control target key start
LH: loop header
LB: loop body
LE: loop exit
PB: predicated region body
PF: predicated region fallthrough
CT: control target
= control target key end

     0   :  { %v2742_v2 = vmov 0   ;;  %s3224_s0 = inlined_call_operand.vmem [shape: s32[48,1], index: 0, kind: input, shape index: {}]   ;;  %s3225_s1 = inlined_call_operand.vmem [shape: f32[48,32], index: 1, kind: input, shape index: {}]   ;;  %s3226_s2 = inlined_call_operand.vmem [shape: f32[160,96], index: 2, kind: input, shape index: {}]   ;;  %s3227_s3 = inlined_call_operand.vmem [shape: f32[5,96], index: 3, kind: input, shape index: {}]   ;;  %s3228_s4 = inlined_call_operand.vmem [shape: f32[64,32], index: 4, kind: input, shape index: {}]   ;;  %s3229_s5 = inlined_call_operand.hbm [shape: f32[1,1], index: 5, kind: output, shape index: {}]  }
   0x1   :  { %v21_v0 = vld [vmem:[%s3224_s0] sm:$0xff]  ;;  %v28_v1 = vld [vmem:[%s3225_s1 + $0x8] sm:$0xff]  ;;  %2632 = vset.pattern.permute.xlu0 %v2742_v2 }
   0x2   :  { %2431 = vmatprep.subr.mxu0 %v28_v1  ;;  %v27_v3 = vld [vmem:[%s3225_s1] sm:$0xff] }
   0x3   :  { %10 = vsyncpa [#allocation3], 0  ;;  %69 = vperm.xlu0 %2632, %v21_v0   ;;  %2432 = vmatpush3.msra.mxu0 %v28_v1  ;;  %v22_v4 = vld [vmem:[%s3224_s0 + $0x8] sm:$0xff]  ;;  %v2743_v5 = vmov 0.0   ;;  %v36_v6 = vld [vmem:[%s3226_s2 + $0x18] sm:$0xff]  ;;  %v66_v8 = vlaneseq  ;;  %vm78_vm0 = vcmask 130048  }
   0x4   :  { %2433 = vmatprep.subr.mxu0 %v27_v3  ;;  %2633 = vset.pattern.permute.xlu1 %v2742_v2  ;;  %v35_v7 = vld [vmem:[%s3226_s2 + $0x10] sm:$0xff]  ;;  %v2807_v13 = vld [vmem:[%s3226_s2 + $0x38] sm:$0xff]  ;;  %vm2744_vm3 = vmmov 0   ;;  %v2822_v16 = vld [vmem:[%s3226_s2 + $0x28] sm:$0xff]  ;;  %vm164_vm4 = vcmask 261120   ;;  %s2745_s19 = smov 64  }
   0x5   :  { %2434 = vmatpush3.msra.mxu0 %v27_v3  ;;  %2438 = vmatprep.subr.mxu1 %v36_v6  ;;  %v2799_v9 = vand.u32 127, %v66_v8  ;;  %v2813_v15 = vld [vmem:[%s3226_s2 + $0x30] sm:$0xff]  ;;  %v2829_v17 = vld [vmem:[%s3226_s2 + $0x20] sm:$0xff]  ;;  %v34_v18 = vld [vmem:[%s3226_s2 + $0x8] sm:$0xff]  ;;  %s2746_s22 = smov 96   ;;  %vm1105_vm5 = vcmask 257026  }
   0x6   :  { %2449 = vmatprep.subr.mxu0 %v2743_v5  ;;  %2439 = vmatpush3.msra.mxu1 %v36_v6  ;;  %v33_v19 = vld [vmem:[%s3226_s2] sm:$0xff]  ;;  %vm1094_vm6 = vcmask 254976   ;;  %vm1116_vm7 = vcmask 259076   ;;  %vm1125_vm8 = vcmask 261126   ;;  %vm1595_vm11 = vcmask 15360  }
   0x7   :  { %72 = vperm.xlu0 %2632, %v22_v4   ;;  %2440 = vmatprep.subr.mxu1 %v35_v7  ;;  %v2861_v22 = vld [vmem:[%s3227_s3 + $0x1] ss:$0 sm:$0xff]  ;;  %v2291_v26 = vld [vmem:[%s3227_s3] ss:$0 sm:$0xff]  ;;  %vm1602_vm14 = vcmask 1041408  }
   0x8   :  { %2441 = vmatpush3.msra.mxu1 %v35_v7 }
   0x9   :  { %2442 = vmatprep.subr.mxu1 %v34_v18 }
   0xa   :  { %2443 = vmatpush3.msra.mxu1 %v34_v18 }
   0xb   :  { %2444 = vmatprep.subr.mxu1 %v33_v19 }
   0xc   :  { %2445 = vmatpush3.msra.mxu1 %v33_v19 }
   0xd   :  { %2460 = vmatprep.subr.mxu1 %v2743_v5 }
  0x7e   :  { %v70_v10 = vpop.permute.xlu0 %69 }
  0x7f   :  { %vm74_vm1 = vcmp.eq.s32.totalorder %v2799_v9, %v70_v10 }
  0x80   :  { %v76_v11 = vsel %vm74_vm1, 1.0, %v2743_v5  ;;  %vm2256_vm1 = vcmask 7168  }
  0x81   :  { %2435 = vmatprep.mubr.msk.f32.mxu0 %vm78_vm0, %v76_v11 }
  0x82   :  { %v73_v12 = vpop.permute.xlu0 %72 }
  0x83   :  { %vm75_vm2 = vcmp.eq.s32.totalorder %v2799_v9, %v73_v12 }
  0x84   :  { %v77_v14 = vsel %vm75_vm2, 1.0, %v2743_v5  ;;  %vm2273_vm2 = vcmask 0  }
  0x85   :  { %2436 = vmatmul.mubr.msk.f32.vlgmr.msra.gmra.mxu0 %vm78_vm0, %v77_v14 }
  0x86   :  { %2450 = vmatpush3.msra.mxu0 %v2807_v13  ;;  %2457 = vmatprep.mubr.msk.f32.mxu0 %vm2744_vm3, %v2743_v5 }
  0x87   :  { %2451 = vmatprep.subr.mxu0 %v2743_v5 }
  0x88   :  { %2452 = vmatpush3.msra.mxu0 %v2813_v15 }
  0x89   :  { %2453 = vmatprep.subr.mxu0 %v2743_v5 }
  0x8a   :  { %2454 = vmatpush3.msra.mxu0 %v2822_v16 }
  0x8b   :  { %2455 = vmatprep.subr.mxu0 %v2743_v5 }
  0x8c   :  { %2456 = vmatpush3.msra.mxu0 %v2829_v17 }
  0x8d   :  { %2458 = vmatmul.mubr.f32.vlgmr.msra.gmra.mxu0 %v2743_v5  ;;  %2471 = vmatprep.subr.mxu0 %v2743_v5 }
  0x8e   :  { %2472 = vmatpush3.msra.mxu0 %v2807_v13  ;;  %2479 = vmatprep.mubr.msk.f32.mxu0 %vm2744_vm3, %v2743_v5 }
  0x8f   :  { %2473 = vmatprep.subr.mxu0 %v2743_v5 }
  0x90   :  { %2474 = vmatpush3.msra.mxu0 %v2813_v15 }
  0x91   :  { %2475 = vmatprep.subr.mxu0 %v2743_v5 }
  0x92   :  { %2476 = vmatpush3.msra.mxu0 %v2822_v16 }
  0x93   :  { %2477 = vmatprep.subr.mxu0 %v2743_v5 }
  0x94   :  { %2478 = vmatpush3.msra.mxu0 %v2829_v17 }
  0x95   :  { %2493 = vmatprep.subr.mxu0 %v2743_v5 }
 0x145   :  { %v2437_v20 = vpop.f32.mrf.mxu0 }
 0x147   :  { %v151_v21 = vpop.f32.mrf.mxu0 }
 0x148   :  { %2446 = vmatprep.mubr.msk.f32.mxu1 %vm164_vm4, %v151_v21 }
 0x149   :  { %2447 = vmatmul.mubr.msk.f32.vlgmr.msra.gmra.mxu1 %vm164_vm4, %v2437_v20 }
 0x14a   :  { %2461 = vmatpush3.msra.mxu1 %v2807_v13  ;;  %2468 = vmatprep.mubr.msk.f32.mxu1 %vm2744_vm3, %v2743_v5 }
 0x14b   :  { %2462 = vmatprep.subr.mxu1 %v2743_v5 }
 0x14c   :  { %2463 = vmatpush3.msra.mxu1 %v2813_v15 }
 0x14d   :  { %v319_v23 = vpop.f32.mrf.mxu0  ;;  %2464 = vmatprep.subr.mxu1 %v2743_v5 }
 0x14e   :  { %v320_v24 = vadd.f32 %v2861_v22, %v319_v23  ;;  %2465 = vmatpush3.msra.mxu1 %v2822_v16 }
 0x14f   :  { %v2459_v25 = vpop.f32.mrf.mxu0  ;;  %2466 = vmatprep.subr.mxu1 %v2743_v5 }
 0x150   :  { %331 = vrot.lane.b32.xlu1 %v320_v24, %s2745_s19  ;;  %2467 = vmatpush3.msra.mxu1 %v2829_v17 }
 0x151   :  { %2482 = vmatprep.subr.mxu1 %v2743_v5 }
 0x1c2   :  { %v332_v35 = vpop.permute.xlu1 %331 }
 0x209   :  { %v2448_v27 = vpop.f32.mrf.mxu1 }
 0x20a   :  { %v2875_v28 = vadd.f32 %v2448_v27, %v2291_v26 }
 0x20b   :  { %v237_v29 = vpop.f32.mrf.mxu1 }
 0x20c   :  { %v2877_v30 = vadd.f32 %v2291_v26, %v237_v29 }
 0x20e   :  { %v323_v31 = vadd.f32 %v320_v24, %v2877_v30 }
 0x210   :  { %v2295_v32 = vmul.f32 -1.442695, %v323_v31 }
 0x212   :  { %2634 = vpow2.f32 %v2295_v32 }
 0x21f   :  { %v2635_v33 = vpop.eup %2634 }
 0x220   :  { %v327_v34 = vadd.f32 1.0, %v2635_v33 }
 0x222   :  { %2636 = vrcp.f32 %v327_v34 }
 0x22f   :  { %v2637_v36 = vpop.eup %2636 }
 0x230   :  { %v334_v37 = vmul.f32 %v2637_v36, %v332_v35  ;;  %v341_v41 = vsub.f32 1.0, %v2637_v36  ;;  %v347_v43 = vmul.f32 0.0, %v2637_v36 }
 0x232   :  { %336 = vrot.lane.b32.xlu1 %v334_v37, %s2745_s19 }
 0x2a4   :  { %v337_v38 = vpop.permute.xlu1 %336 }
 0x2a5   :  { %v339_v39 = vadd.f32 %v337_v38, %v2877_v30 }
 0x2a7   :  { %2638 = vtanh.f32 %v339_v39 }
 0x2b4   :  { %v2639_v40 = vpop.eup %2638 }
 0x2b5   :  { %343 = vrot.lane.b32.xlu0 %v2639_v40, %s2746_s22 }
 0x327   :  { %v344_v42 = vpop.permute.xlu0 %343 }
 0x328   :  { %v346_v44 = vmul.f32 %v344_v42, %v341_v41 }
 0x32a   :  { %v2883_v45 = vadd.f32 %v347_v43, %v346_v44 }
 0x32c   :  { %350 = vrot.lane.b32.xlu1 %v2883_v45, %s2746_s22  ;;  %v450_v62 = vrot.slane %v2883_v45, 6 }
 0x39e   :  { %v351_v46 = vpop.permute.xlu1 %350 }
 0x39f   :  { %2469 = vmatmul.mubr.msk.f32.vlgmr.msra.gmra.mxu1 %vm164_vm4, %v351_v46 }
 0x3a0   :  { %2483 = vmatpush3.msra.mxu1 %v2807_v13  ;;  %2490 = vmatprep.mubr.msk.f32.mxu1 %vm2744_vm3, %v2743_v5 }
 0x3a1   :  { %2484 = vmatprep.subr.mxu1 %v2743_v5 }
 0x3a2   :  { %2485 = vmatpush3.msra.mxu1 %v2813_v15 }
 0x3a3   :  { %2486 = vmatprep.subr.mxu1 %v2743_v5 }
 0x3a4   :  { %2487 = vmatpush3.msra.mxu1 %v2822_v16 }
 0x3a5   :  { %2488 = vmatprep.subr.mxu1 %v2743_v5 }
 0x3a6   :  { %2489 = vmatpush3.msra.mxu1 %v2829_v17 }
 0x3a7   :  { %2504 = vmatprep.subr.mxu1 %v2743_v5 }
 0x45f   :  { %v420_v47 = vpop.f32.mrf.mxu1 }
 0x460   :  { %v421_v48 = vadd.f32 %v2861_v22, %v420_v47 }
 0x461   :  { %v2470_v49 = vpop.f32.mrf.mxu1 }
 0x462   :  { %v425_v50 = vrot.slane %v421_v48, 6 }
 0x464   :  { %434 = vrot.lane.b32.xlu0 %v425_v50, %s2745_s19  ;;  %v427_v51 = vadd.f32 %v425_v50, %v2877_v30 }
 0x466   :  { %v2297_v52 = vmul.f32 -1.442695, %v427_v51 }
 0x468   :  { %2640 = vpow2.f32 %v2297_v52 }
 0x475   :  { %v2641_v53 = vpop.eup %2640 }
 0x476   :  { %v431_v54 = vadd.f32 1.0, %v2641_v53 }
 0x478   :  { %2642 = vrcp.f32 %v431_v54 }
 0x485   :  { %v2643_v55 = vpop.eup %2642 }
 0x486   :  { %v444_v61 = vsub.f32 1.0, %v2643_v55  ;;  %v452_v1 = vmul.f32 %v2643_v55, %v450_v62 }
 0x4d6   :  { %v435_v56 = vpop.permute.xlu0 %434 }
 0x4d7   :  { %v437_v57 = vmul.f32 %v2643_v55, %v435_v56 }
 0x4d9   :  { %439 = vrot.lane.b32.xlu1 %v437_v57, %s2745_s19 }
 0x54b   :  { %v440_v58 = vpop.permute.xlu1 %439 }
 0x54c   :  { %v442_v59 = vadd.f32 %v440_v58, %v2877_v30 }
 0x54e   :  { %2644 = vtanh.f32 %v442_v59 }
 0x55b   :  { %v2645_v60 = vpop.eup %2644 }
 0x55c   :  { %446 = vrot.lane.b32.xlu0 %v2645_v60, %s2746_s22 }
 0x5ce   :  { %v447_v63 = vpop.permute.xlu0 %446 }
 0x5cf   :  { %v449_v0 = vmul.f32 %v447_v63, %v444_v61 }
 0x5d1   :  { %v2905_v2 = vadd.f32 %v452_v1, %v449_v0 }
 0x5d3   :  { %v455_v3 = vrot.slane %v2905_v2, 2  ;;  %v556_v29 = vrot.slane %v2905_v2, 6 }
 0x5d5   :  { %456 = vrot.lane.b32.xlu1 %v455_v3, %s2746_s22 }
 0x647   :  { %v457_v4 = vpop.permute.xlu1 %456 }
 0x648   :  { %2480 = vmatmul.mubr.msk.f32.vlgmr.msra.gmra.mxu0 %vm164_vm4, %v457_v4 }
 0x649   :  { %2494 = vmatpush3.msra.mxu0 %v2807_v13  ;;  %2501 = vmatprep.mubr.msk.f32.mxu0 %vm2744_vm3, %v2743_v5 }
 0x64a   :  { %2495 = vmatprep.subr.mxu0 %v2743_v5 }
 0x64b   :  { %2496 = vmatpush3.msra.mxu0 %v2813_v15 }
 0x64c   :  { %2497 = vmatprep.subr.mxu0 %v2743_v5 }
 0x64d   :  { %2498 = vmatpush3.msra.mxu0 %v2822_v16 }
 0x64e   :  { %2499 = vmatprep.subr.mxu0 %v2743_v5 }
 0x64f   :  { %2500 = vmatpush3.msra.mxu0 %v2829_v17 }
 0x650   :  { %2515 = vmatprep.subr.mxu0 %v2743_v5 }
 0x708   :  { %v526_v6 = vpop.f32.mrf.mxu0 }
 0x709   :  { %v527_v7 = vadd.f32 %v2861_v22, %v526_v6 }
 0x70a   :  { %v2481_v10 = vpop.f32.mrf.mxu0 }
 0x70b   :  { %v531_v11 = vrot.slane %v527_v7, 4 }
 0x70d   :  { %540 = vrot.lane.b32.xlu0 %v531_v11, %s2745_s19  ;;  %v533_v12 = vadd.f32 %v531_v11, %v2877_v30 }
 0x70f   :  { %v2299_v14 = vmul.f32 -1.442695, %v533_v12 }
 0x711   :  { %2646 = vpow2.f32 %v2299_v14 }
 0x71e   :  { %v2647_v18 = vpop.eup %2646 }
 0x71f   :  { %v537_v19 = vadd.f32 1.0, %v2647_v18 }
 0x721   :  { %2648 = vrcp.f32 %v537_v19 }
 0x72e   :  { %v2649_v20 = vpop.eup %2648 }
 0x72f   :  { %v550_v27 = vsub.f32 1.0, %v2649_v20  ;;  %v558_v32 = vmul.f32 %v2649_v20, %v556_v29 }
 0x77f   :  { %v541_v21 = vpop.permute.xlu0 %540 }
 0x780   :  { %v543_v23 = vmul.f32 %v2649_v20, %v541_v21 }
 0x782   :  { %545 = vrot.lane.b32.xlu1 %v543_v23, %s2745_s19 }
 0x7f4   :  { %v546_v24 = vpop.permute.xlu1 %545 }
 0x7f5   :  { %v548_v25 = vadd.f32 %v546_v24, %v2877_v30 }
 0x7f7   :  { %2650 = vtanh.f32 %v548_v25 }
 0x804   :  { %v2651_v26 = vpop.eup %2650 }
 0x805   :  { %552 = vrot.lane.b32.xlu0 %v2651_v26, %s2746_s22 }
 0x877   :  { %v553_v31 = vpop.permute.xlu0 %552 }
 0x878   :  { %v555_v33 = vmul.f32 %v553_v31, %v550_v27 }
 0x87a   :  { %v2927_v34 = vadd.f32 %v558_v32, %v555_v33 }
 0x87c   :  { %v561_v35 = vrot.slane %v2927_v34, 4  ;;  %v662_v53 = vrot.slane %v2927_v34, 6 }
 0x87e   :  { %562 = vrot.lane.b32.xlu1 %v561_v35, %s2746_s22 }
 0x8f0   :  { %v563_v36 = vpop.permute.xlu1 %562 }
 0x8f1   :  { %2491 = vmatmul.mubr.msk.f32.vlgmr.msra.gmra.mxu1 %vm164_vm4, %v563_v36 }
 0x8f2   :  { %2505 = vmatpush3.msra.mxu1 %v2807_v13  ;;  %2512 = vmatprep.mubr.msk.f32.mxu1 %vm2744_vm3, %v2743_v5 }
 0x8f3   :  { %2506 = vmatprep.subr.mxu1 %v2743_v5 }
 0x8f4   :  { %2507 = vmatpush3.msra.mxu1 %v2813_v15 }
 0x8f5   :  { %2508 = vmatprep.subr.mxu1 %v2743_v5 }
 0x8f6   :  { %2509 = vmatpush3.msra.mxu1 %v2822_v16 }
 0x8f7   :  { %2510 = vmatprep.subr.mxu1 %v2743_v5 }
 0x8f8   :  { %2511 = vmatpush3.msra.mxu1 %v2829_v17 }
 0x8f9   :  { %2526 = vmatprep.subr.mxu1 %v2743_v5 }
 0x9b1   :  { %v632_v37 = vpop.f32.mrf.mxu1 }
 0x9b2   :  { %v633_v38 = vadd.f32 %v2861_v22, %v632_v37 }
 0x9b3   :  { %v2492_v39 = vpop.f32.mrf.mxu1 }
 0x9b4   :  { %v637_v40 = vrot.slane %v633_v38, 2 }
 0x9b6   :  { %646 = vrot.lane.b32.xlu0 %v637_v40, %s2745_s19  ;;  %v639_v41 = vadd.f32 %v637_v40, %v2877_v30 }
 0x9b8   :  { %v2301_v42 = vmul.f32 -1.442695, %v639_v41 }
 0x9ba   :  { %2652 = vpow2.f32 %v2301_v42 }
 0x9c7   :  { %v2653_v43 = vpop.eup %2652 }
 0x9c8   :  { %v643_v44 = vadd.f32 1.0, %v2653_v43 }
 0x9ca   :  { %2654 = vrcp.f32 %v643_v44 }
 0x9d7   :  { %v2655_v46 = vpop.eup %2654 }
 0x9d8   :  { %v656_v52 = vsub.f32 1.0, %v2655_v46  ;;  %v664_v55 = vmul.f32 %v2655_v46, %v662_v53 }
 0xa28   :  { %v647_v47 = vpop.permute.xlu0 %646 }
 0xa29   :  { %v649_v48 = vmul.f32 %v2655_v46, %v647_v47 }
 0xa2b   :  { %651 = vrot.lane.b32.xlu1 %v649_v48, %s2745_s19 }
 0xa9d   :  { %v652_v49 = vpop.permute.xlu1 %651 }
 0xa9e   :  { %v654_v50 = vadd.f32 %v652_v49, %v2877_v30 }
 0xaa0   :  { %2656 = vtanh.f32 %v654_v50 }
 0xaad   :  { %v2657_v51 = vpop.eup %2656 }
 0xaae   :  { %658 = vrot.lane.b32.xlu0 %v2657_v51, %s2746_s22 }
 0xb20   :  { %v659_v54 = vpop.permute.xlu0 %658 }
 0xb21   :  { %v661_v56 = vmul.f32 %v659_v54, %v656_v52 }
 0xb23   :  { %v2949_v57 = vadd.f32 %v664_v55, %v661_v56 }
 0xb25   :  { %v667_v58 = vrot.slane %v2949_v57, 6 }
 0xb27   :  { %668 = vrot.lane.b32.xlu1 %v667_v58, %s2746_s22 }
 0xb99   :  { %v669_v59 = vpop.permute.xlu1 %668 }
 0xb9a   :  { %2502 = vmatmul.mubr.msk.f32.vlgmr.msra.gmra.mxu0 %vm164_vm4, %v669_v59 }
 0xb9b   :  { %2516 = vmatpush3.msra.mxu0 %v2807_v13  ;;  %2523 = vmatprep.mubr.msk.f32.mxu0 %vm2744_vm3, %v2743_v5 }
 0xb9c   :  { %2517 = vmatprep.subr.mxu0 %v2743_v5 }
 0xb9d   :  { %2518 = vmatpush3.msra.mxu0 %v2813_v15 }
 0xb9e   :  { %2519 = vmatprep.subr.mxu0 %v2743_v5 }
 0xb9f   :  { %2520 = vmatpush3.msra.mxu0 %v2822_v16 }
 0xba0   :  { %2521 = vmatprep.subr.mxu0 %v2743_v5 }
 0xba1   :  { %2522 = vmatpush3.msra.mxu0 %v2829_v17 }
 0xc5a   :  { %v738_v30 = vpop.f32.mrf.mxu0 }
 0xc5b   :  { %v739_v60 = vadd.f32 %v2861_v22, %v738_v30 }
 0xc5c   :  { %v2503_v61 = vpop.f32.mrf.mxu0 }
 0xc5d   :  { %750 = vrot.lane.b32.xlu0 %v739_v60, %s2745_s19  ;;  %v742_v62 = vadd.f32 %v739_v60, %v2875_v28 }
 0xc5f   :  { %v2303_v63 = vmul.f32 -1.442695, %v742_v62 }
 0xc61   :  { %2658 = vpow2.f32 %v2303_v63 }
 0xc6e   :  { %v2659_v0 = vpop.eup %2658 }
 0xc6f   :  { %v746_v1 = vadd.f32 1.0, %v2659_v0 }
 0xc71   :  { %2660 = vrcp.f32 %v746_v1 }
 0xc7e   :  { %v2661_v3 = vpop.eup %2660 }
 0xc7f   :  { %v760_v12 = vsub.f32 1.0, %v2661_v3  ;;  %v767_v18 = vmul.f32 %v2661_v3, %v667_v58 }
 0xccf   :  { %v751_v4 = vpop.permute.xlu0 %750 }
 0xcd0   :  { %v753_v6 = vmul.f32 %v2661_v3, %v751_v4 }
 0xcd2   :  { %755 = vrot.lane.b32.xlu1 %v753_v6, %s2745_s19 }
 0xd44   :  { %v756_v7 = vpop.permute.xlu1 %755 }
 0xd45   :  { %v758_v10 = vadd.f32 %v756_v7, %v2875_v28 }
 0xd47   :  { %2662 = vtanh.f32 %v758_v10 }
 0xd54   :  { %v2663_v11 = vpop.eup %2662 }
 0xd55   :  { %762 = vrot.lane.b32.xlu0 %v2663_v11, %s2746_s22 }
 0xdc7   :  { %v763_v14 = vpop.permute.xlu0 %762 }
 0xdc8   :  { %v765_v19 = vmul.f32 %v763_v14, %v760_v12 }
 0xdca   :  { %v2969_v20 = vadd.f32 %v767_v18, %v765_v19 }
 0xdcc   :  { %770 = vrot.lane.b32.xlu1 %v2969_v20, %s2746_s22  ;;  %v870_v37 = vrot.slane %v2969_v20, 6 }
 0xe3e   :  { %v771_v21 = vpop.permute.xlu1 %770 }
 0xe3f   :  { %2513 = vmatmul.mubr.msk.f32.vlgmr.msra.gmra.mxu1 %vm164_vm4, %v771_v21 }
 0xe40   :  { %2527 = vmatpush3.msra.mxu1 %v2807_v13  ;;  %2534 = vmatprep.mubr.msk.f32.mxu1 %vm2744_vm3, %v2743_v5 }
 0xe41   :  { %2528 = vmatprep.subr.mxu1 %v2743_v5 }
 0xe42   :  { %2529 = vmatpush3.msra.mxu1 %v2813_v15 }
 0xe43   :  { %2530 = vmatprep.subr.mxu1 %v2743_v5 }
 0xe44   :  { %2531 = vmatpush3.msra.mxu1 %v2822_v16 }
 0xe45   :  { %2532 = vmatprep.subr.mxu1 %v2743_v5 }
 0xe46   :  { %2533 = vmatpush3.msra.mxu1 %v2829_v17 }
 0xe47   :  { %2548 = vmatprep.subr.mxu1 %v2743_v5 }
 0xeff   :  { %v840_v23 = vpop.f32.mrf.mxu1 }
 0xf00   :  { %v841_v13 = vadd.f32 %v2861_v22, %v840_v23 }
 0xf01   :  { %v2514_v24 = vpop.f32.mrf.mxu1 }
 0xf02   :  { %v845_v25 = vrot.slane %v841_v13, 6 }
 0xf04   :  { %854 = vrot.lane.b32.xlu0 %v845_v25, %s2745_s19  ;;  %v847_v26 = vadd.f32 %v845_v25, %v2875_v28 }
 0xf06   :  { %v2305_v15 = vmul.f32 -1.442695, %v847_v26 }
 0xf08   :  { %2664 = vpow2.f32 %v2305_v15 }
 0xf15   :  { %v2665_v27 = vpop.eup %2664 }
 0xf16   :  { %v851_v29 = vadd.f32 1.0, %v2665_v27 }
 0xf18   :  { %2666 = vrcp.f32 %v851_v29 }
 0xf25   :  { %v2667_v16 = vpop.eup %2666 }
 0xf26   :  { %v864_v36 = vsub.f32 1.0, %v2667_v16  ;;  %v872_v40 = vmul.f32 %v2667_v16, %v870_v37 }
 0xf76   :  { %v855_v31 = vpop.permute.xlu0 %854 }
 0xf77   :  { %v857_v32 = vmul.f32 %v2667_v16, %v855_v31 }
 0xf79   :  { %859 = vrot.lane.b32.xlu1 %v857_v32, %s2745_s19 }
 0xfeb   :  { %v860_v17 = vpop.permute.xlu1 %859 }
 0xfec   :  { %v862_v33 = vadd.f32 %v860_v17, %v2875_v28 }
 0xfee   :  { %2668 = vtanh.f32 %v862_v33 }
 0xffb   :  { %v2669_v35 = vpop.eup %2668 }
 0xffc   :  { %866 = vrot.lane.b32.xlu0 %v2669_v35, %s2746_s22 }
0x106e   :  { %v867_v38 = vpop.permute.xlu0 %866 }
0x106f   :  { %v869_v39 = vmul.f32 %v867_v38, %v864_v36 }
0x1071   :  { %v2991_v41 = vadd.f32 %v872_v40, %v869_v39 }
0x1073   :  { %v875_v42 = vrot.slane %v2991_v41, 2  ;;  %v976_v60 = vrot.slane %v2991_v41, 6 }
0x1075   :  { %876 = vrot.lane.b32.xlu1 %v875_v42, %s2746_s22 }
0x10e7   :  { %v877_v43 = vpop.permute.xlu1 %876 }
0x10e8   :  { %2524 = vmatmul.mubr.msk.f32.vlgmr.msra.gmra.mxu0 %vm164_vm4, %v877_v43 }
0x11a8   :  { %v946_v44 = vpop.f32.mrf.mxu0 }
0x11a9   :  { %v947_v46 = vadd.f32 %v2861_v22, %v946_v44 }
0x11aa   :  { %v2525_v47 = vpop.f32.mrf.mxu0 }
0x11ab   :  { %v951_v48 = vrot.slane %v947_v46, 4 }
0x11ad   :  { %960 = vrot.lane.b32.xlu0 %v951_v48, %s2745_s19  ;;  %v953_v49 = vadd.f32 %v951_v48, %v2875_v28 }
0x11af   :  { %v2307_v50 = vmul.f32 -1.442695, %v953_v49 }
0x11b1   :  { %2670 = vpow2.f32 %v2307_v50 }
0x11be   :  { %v2671_v51 = vpop.eup %2670 }
0x11bf   :  { %v957_v52 = vadd.f32 1.0, %v2671_v51 }
0x11c1   :  { %2672 = vrcp.f32 %v957_v52 }
0x11ce   :  { %v2673_v53 = vpop.eup %2672 }
0x11cf   :  { %v970_v30 = vsub.f32 1.0, %v2673_v53  ;;  %v978_v62 = vmul.f32 %v2673_v53, %v976_v60 }
0x121f   :  { %v961_v54 = vpop.permute.xlu0 %960 }
0x1220   :  { %v963_v55 = vmul.f32 %v2673_v53, %v961_v54 }
0x1222   :  { %965 = vrot.lane.b32.xlu1 %v963_v55, %s2745_s19 }
0x1294   :  { %v966_v56 = vpop.permute.xlu1 %965 }
0x1295   :  { %v968_v58 = vadd.f32 %v966_v56, %v2875_v28 }
0x1297   :  { %2674 = vtanh.f32 %v968_v58 }
0x12a4   :  { %v2675_v59 = vpop.eup %2674 }
0x12a5   :  { %972 = vrot.lane.b32.xlu0 %v2675_v59, %s2746_s22 }
0x1317   :  { %v973_v61 = vpop.permute.xlu0 %972 }
0x1318   :  { %v975_v63 = vmul.f32 %v973_v61, %v970_v30 }
0x131a   :  { %v3003_v0 = vadd.f32 %v978_v62, %v975_v63 }
0x131c   :  { %v981_v1 = vrot.slane %v3003_v0, 4  ;;  %v1082_v26 = vrot.slane %v3003_v0, 6 }
0x131e   :  { %982 = vrot.lane.b32.xlu1 %v981_v1, %s2746_s22 }
0x1390   :  { %v983_v3 = vpop.permute.xlu1 %982 }
0x1391   :  { %2535 = vmatmul.mubr.msk.f32.vlgmr.msra.gmra.mxu1 %vm164_vm4, %v983_v3 }
0x1392   :  { %2556 = vmatprep.mubr.msk.f32.mxu1 %vm2744_vm3, %v2743_v5 }
0x1451   :  { %v1052_v4 = vpop.f32.mrf.mxu1 }
0x1452   :  { %v1053_v6 = vadd.f32 %v2861_v22, %v1052_v4 }
0x1453   :  { %v2536_v7 = vpop.f32.mrf.mxu1 }
0x1454   :  { %v1057_v10 = vrot.slane %v1053_v6, 2 }
0x1456   :  { %1066 = vrot.lane.b32.xlu0 %v1057_v10, %s2745_s19  ;;  %v1059_v11 = vadd.f32 %v1057_v10, %v2875_v28 }
0x1458   :  { %v2309_v12 = vmul.f32 -1.442695, %v1059_v11 }
0x145a   :  { %2676 = vpow2.f32 %v2309_v12 }
0x1467   :  { %v2677_v14 = vpop.eup %2676 }
0x1468   :  { %v1063_v18 = vadd.f32 1.0, %v2677_v14 }
0x146a   :  { %2678 = vrcp.f32 %v1063_v18 }
0x1477   :  { %v2679_v19 = vpop.eup %2678 }
0x1478   :  { %v1076_v25 = vsub.f32 1.0, %v2679_v19  ;;  %v1084_v27 = vmul.f32 %v2679_v19, %v1082_v26 }
0x14c8   :  { %v1067_v21 = vpop.permute.xlu0 %1066 }
0x14c9   :  { %v1069_v23 = vmul.f32 %v2679_v19, %v1067_v21 }
0x14cb   :  { %1071 = vrot.lane.b32.xlu1 %v1069_v23, %s2745_s19 }
0x153d   :  { %v1072_v13 = vpop.permute.xlu1 %1071 }
0x153e   :  { %v1074_v24 = vadd.f32 %v1072_v13, %v2875_v28 }
0x1540   :  { %2680 = vtanh.f32 %v1074_v24 }
0x154d   :  { %v2681_v22 = vpop.eup %2680 }
0x154e   :  { %1078 = vrot.lane.b32.xlu0 %v2681_v22, %s2746_s22 }
0x15c0   :  { %v1079_v15 = vpop.permute.xlu0 %1078 }
0x15c1   :  { %v1081_v29 = vmul.f32 %v1079_v15, %v1076_v25 }
0x15c3   :  { %v3017_v16 = vadd.f32 %v1084_v27, %v1081_v29 }
0x15c5   :  { %v1098_v31 = vrot.slane %v3017_v16, 4  ;;  %v3021_v32 = vrot.slane %v3017_v16, 6  ;;  %v1109_v33 = vrot.slane %v3017_v16, 2  ;;  %v1120_v36 = vmul.f32 %v3017_v16, %v2949_v57 }
0x15c6   :  { %v1153_v40 = vmul.f32 %v3017_v16, %v3017_v16 }
0x15c7   :  { %v1100_v17 = vmul.f32 %v1098_v31, %v2905_v2  ;;  %v1089_v28 = vmul.f32 %v3021_v32, %v2883_v45  ;;  %v1111_v35 = vmul.f32 %v1109_v33, %v2927_v34  ;;  %v1129_v37 = vmul.f32 %v3021_v32, %v2969_v20 }
0x15c8   :  { %v1137_v38 = vmul.f32 %v1098_v31, %v2991_v41  ;;  %v1145_v39 = vmul.f32 %v1109_v33, %v3003_v0 }
0x15c9   :  { %1102 = vrot.lane.b32.xlu1 %v1100_v17, %s2746_s22  ;;  %1091 = vrot.lane.b32.xlu0 %v1089_v28, %s2746_s22 }
0x15cd   :  { %1113 = vrot.lane.b32.xlu1 %v1111_v35, %s2746_s22  ;;  %1122 = vrot.lane.b32.xlu0 %v1120_v36, %s2746_s22 }
0x15d1   :  { %1131 = vrot.lane.b32.xlu1 %v1129_v37, %s2746_s22  ;;  %1139 = vrot.lane.b32.xlu0 %v1137_v38, %s2746_s22 }
0x15d5   :  { %1147 = vrot.lane.b32.xlu1 %v1145_v39, %s2746_s22  ;;  %1155 = vrot.lane.b32.xlu0 %v1153_v40, %s2746_s22 }
0x163b   :  { %v1103_v42 = vpop.permute.xlu1 %1102  ;;  %v1092_v43 = vpop.permute.xlu0 %1091 }
0x163c   :  { %v1106_v44 = vsel %vm1105_vm5, %v1103_v42, 0.0  ;;  %v1095_v46 = vsel %vm1094_vm6, %v1092_v43, 0.0 }
0x163d   :  { %1107 = vadd.xlane.f32.xlu1 %v1106_v44  ;;  %1096 = vadd.xlane.f32.xlu0 %v1095_v46 }
0x163f   :  { %v1114_v47 = vpop.permute.xlu1 %1113  ;;  %v1123_v48 = vpop.permute.xlu0 %1122 }
0x1640   :  { %v1117_v49 = vsel %vm1116_vm7, %v1114_v47, 0.0  ;;  %v1126_v50 = vsel %vm1125_vm8, %v1123_v48, 0.0 }
0x1641   :  { %1118 = vadd.xlane.f32.xlu0 %v1117_v49  ;;  %1127 = vadd.xlane.f32.xlu1 %v1126_v50 }
0x1643   :  { %v1132_v51 = vpop.permute.xlu1 %1131  ;;  %v1140_v52 = vpop.permute.xlu0 %1139 }
0x1644   :  { %v1134_v53 = vsel %vm1094_vm6, %v1132_v51, 0.0  ;;  %v1142_v54 = vsel %vm1105_vm5, %v1140_v52, 0.0 }
0x1645   :  { %1135 = vadd.xlane.f32.xlu0 %v1134_v53  ;;  %1143 = vadd.xlane.f32.xlu1 %v1142_v54 }
0x1647   :  { %v1148_v55 = vpop.permute.xlu1 %1147  ;;  %v1156_v56 = vpop.permute.xlu0 %1155 }
0x1648   :  { %v1150_v58 = vsel %vm1116_vm7, %v1148_v55, 0.0  ;;  %v1158_v59 = vsel %vm1125_vm8, %v1156_v56, 0.0 }
0x1649   :  { %1151 = vadd.xlane.f32.xlu0 %v1150_v58  ;;  %1159 = vadd.xlane.f32.xlu1 %v1158_v59 }
0x16c6   :  { %v1108_v30 = vpop.xlane.xlu1 %1107  ;;  %v1097_v60 = vpop.xlane.xlu0 %1096 }
0x16c7   :  { %v1162_v61 = vrot.slane %v1108_v30, 2 }
0x16c9   :  { %v1164_v1 = vmax.f32 %v1097_v60, %v1162_v61 }
0x16ca   :  { %v1128_v62 = vpop.xlane.xlu1 %1127  ;;  %v1119_v63 = vpop.xlane.xlu0 %1118 }
0x16cb   :  { %v1166_v3 = vrot.slane %v1119_v63, 4  ;;  %v1170_v4 = vrot.slane %v1128_v62, 6 }
0x16cd   :  { %v1168_v6 = vmax.f32 %v1164_v1, %v1166_v3 }
0x16ce   :  { %v1144_v7 = vpop.xlane.xlu1 %1143  ;;  %v1136_v10 = vpop.xlane.xlu0 %1135 }
0x16cf   :  { %v1172_v11 = vmax.f32 %v1168_v6, %v1170_v4  ;;  %v1175_v12 = vrot.slane %v1144_v7, 2  ;;  %v23_v6 = vld [vmem:[%s3224_s0 + $0x10] sm:$0xff] }
0x16d1   :  { %v1173_v14 = vmax.f32 %v1172_v11, %v1136_v10  ;;  %v31_v11 = vld [vmem:[%s3225_s1 + $0x20] sm:$0xff] }
0x16d2   :  { %v1160_v18 = vpop.xlane.xlu1 %1159  ;;  %v1152_v19 = vpop.xlane.xlu0 %1151 }
0x16d3   :  { %v1177_v21 = vmax.f32 %v1173_v14, %v1175_v12  ;;  %v1179_v23 = vrot.slane %v1152_v19, 4  ;;  %v1183_v13 = vrot.slane %v1160_v18, 6  ;;  %v30_v12 = vld [vmem:[%s3225_s1 + $0x18] sm:$0xff]  ;;  %v29_v14 = vld [vmem:[%s3225_s1 + $0x10] sm:$0xff] }
0x16d5   :  { %v1181_v24 = vmax.f32 %v1177_v21, %v1179_v23  ;;  %v47_v21 = vld [vmem:[%s3226_s2 + $0x70] sm:$0xff]  ;;  %v46_v23 = vld [vmem:[%s3226_s2 + $0x68] sm:$0xff] }
0x16d7   :  { %v1185_v22 = vmax.f32 %v1181_v24, %v1183_v13 }
0x16d9   :  { %v1186_v25 = vsub.f32 %v1097_v60, %v1185_v22  ;;  %v1190_v26 = vrot.slane %v1185_v22, 6  ;;  %v1195_v15 = vrot.slane %v1185_v22, 4  ;;  %v1200_v27 = vrot.slane %v1185_v22, 2 }
0x16da   :  { %v1205_v38 = vsub.f32 %v1136_v10, %v1185_v22  ;;  %v32_v10 = vld [vmem:[%s3225_s1 + $0x28] sm:$0xff] }
0x16db   :  { %v1187_v29 = vmul.f32 1.442695, %v1186_v25  ;;  %v1192_v31 = vsub.f32 %v1108_v30, %v1190_v26  ;;  %v1197_v17 = vsub.f32 %v1119_v63, %v1195_v15  ;;  %v1202_v28 = vsub.f32 %v1128_v62, %v1200_v27  ;;  %2537 = vmatprep.subr.mxu0 %v32_v10 }
0x16dc   :  { %v1208_v33 = vsub.f32 %v1144_v7, %v1190_v26  ;;  %v1211_v39 = vsub.f32 %v1152_v19, %v1195_v15  ;;  %v1214_v42 = vsub.f32 %v1160_v18, %v1200_v27  ;;  %v1206_v43 = vmul.f32 1.442695, %v1205_v38  ;;  %2538 = vmatpush3.msra.mxu0 %v32_v10  ;;  %v24_v18 = vld [vmem:[%s3224_s0 + $0x18] sm:$0xff]  ;;  %v63_v10 = vld [vmem:[%s3228_s4 + $0x28] sm:$0xff] }
0x16dd   :  { %2682 = vpow2.f32 %v1187_v29  ;;  %v1193_v35 = vmul.f32 1.442695, %v1192_v31  ;;  %v1198_v36 = vmul.f32 1.442695, %v1197_v17  ;;  %v1203_v37 = vmul.f32 1.442695, %v1202_v28  ;;  %2539 = vmatprep.subr.mxu0 %v31_v11 }
0x16de   :  { %v1209_v40 = vmul.f32 1.442695, %v1208_v33  ;;  %v1212_v44 = vmul.f32 1.442695, %v1211_v39  ;;  %v1215_v46 = vmul.f32 1.442695, %v1214_v42  ;;  %2540 = vmatpush3.msra.mxu0 %v31_v11 }
0x16df   :  { %2684 = vpow2.f32 %v1193_v35  ;;  %2541 = vmatprep.subr.mxu0 %v30_v12  ;;  %v48_v19 = vld [vmem:[%s3226_s2 + $0x78] sm:$0xff] }
0x16e0   :  { %2686 = vpow2.f32 %v1198_v36  ;;  %2542 = vmatpush3.msra.mxu0 %v30_v12  ;;  %2549 = vmatpush3.msra.mxu1 %v48_v19  ;;  %v62_v12 = vld [vmem:[%s3228_s4 + $0x20] sm:$0xff] }
0x16e1   :  { %2688 = vpow2.f32 %v1203_v37  ;;  %2543 = vmatprep.subr.mxu0 %v29_v14  ;;  %2550 = vmatprep.subr.mxu1 %v2743_v5 }
0x16e2   :  { %2690 = vpow2.f32 %v1209_v40  ;;  %2544 = vmatpush3.msra.mxu0 %v29_v14  ;;  %2551 = vmatpush3.msra.mxu1 %v47_v21  ;;  %v2312_v21 = vld [vmem:[%s3227_s3 + $0x2] ss:$0 sm:$0xff] }
0x16e3   :  { %2692 = vpow2.f32 %v1206_v43  ;;  %2559 = vmatprep.subr.mxu0 %v2743_v5  ;;  %2552 = vmatprep.subr.mxu1 %v2743_v5 }
0x16e4   :  { %2694 = vpow2.f32 %v1212_v44  ;;  %2553 = vmatpush3.msra.mxu1 %v46_v23  ;;  %v2314_v23 = vld [vmem:[%s3227_s3 + $0x3] ss:$0 sm:$0xff] }
0x16e5   :  { %2696 = vpow2.f32 %v1215_v46  ;;  %2554 = vmatprep.subr.mxu1 %v2743_v5 }
0x16ea   :  { %v2683_v47 = vpop.eup %2682 }
0x16eb   :  { %1244 = vperm.xlu1 %2633, %v2683_v47  }
0x16ec   :  { %v2685_v48 = vpop.eup %2684 }
0x16ed   :  { %v2687_v49 = vpop.eup %2686  ;;  %1249 = vperm.xlu0 %2632, %v2685_v48   ;;  %v1218_v50 = vrot.slane %v2685_v48, 2 }
0x16ee   :  { %v2689_v51 = vpop.eup %2688  ;;  %v1222_v53 = vrot.slane %v2687_v49, 4 }
0x16ef   :  { %1258 = vperm.xlu1 %2633, %v2687_v49   ;;  %v1220_v52 = vadd.f32 %v2683_v47, %v1218_v50  ;;  %v1226_v55 = vrot.slane %v2689_v51, 6  ;;  %v2691_v56 = vpop.eup %2690 }
0x16f0   :  { %v2693_v58 = vpop.eup %2692  ;;  %v1231_v61 = vrot.slane %v2691_v56, 2 }
0x16f1   :  { %1267 = vperm.xlu0 %2632, %v2689_v51   ;;  %v1224_v54 = vadd.f32 %v1222_v53, %v1220_v52  ;;  %v2695_v30 = vpop.eup %2694 }
0x16f2   :  { %v2697_v62 = vpop.eup %2696  ;;  %v1235_v1 = vrot.slane %v2695_v30, 4 }
0x16f3   :  { %v1228_v59 = vadd.f32 %v1226_v55, %v1224_v54  ;;  %v1239_v4 = vrot.slane %v2697_v62, 6  ;;  %v50_v55 = vld [vmem:[%s3226_s2 + $0x88] sm:$0xff] }
0x16f5   :  { %1277 = vperm.xlu0 %2632, %v2693_v58   ;;  %v1229_v60 = vadd.f32 %v2693_v58, %v1228_v59  ;;  %v44_v58 = vld [vmem:[%s3226_s2 + $0x58] sm:$0xff] }
0x16f7   :  { %v1233_v63 = vadd.f32 %v1231_v61, %v1229_v60  ;;  %v42_v60 = vld [vmem:[%s3226_s2 + $0x48] sm:$0xff]  ;;  %v41_v61 = vld [vmem:[%s3226_s2 + $0x40] sm:$0xff] }
0x16f9   :  { %1292 = vperm.xlu0 %2632, %v2695_v30   ;;  %v1237_v3 = vadd.f32 %v1235_v1, %v1233_v63  ;;  %v43_v30 = vld [vmem:[%s3226_s2 + $0x50] sm:$0xff]  ;;  %v1408_v63 = vshrl.u32 %v66_v8, 7 }
0x16fa   :  { %v64_v8 = vld [vmem:[%s3228_s4 + $0x30] sm:$0xff] }
0x16fb   :  { %v1241_v7 = vadd.f32 %v1239_v4, %v1237_v3  ;;  %v1414_v1 = vand.u32 1, %v1408_v63 }
0x16fd   :  { %1317 = vperm.xlu0 %2632, %v23_v6   ;;  %1311 = vperm.xlu1 %2633, %v1241_v7   ;;  %vm1434_vm12 = vcmp.eq.s32.totalorder %v1414_v1, %v2799_v9  ;;  %v65_v7 = vld [vmem:[%s3228_s4 + $0x38] sm:$0xff] }
0x16fe   :  { %v1436_v3 = vsel %vm1434_vm12, 1.0, %v2743_v5 }
0x1701   :  { %1283 = vperm.xlu1 %2633, %v2691_v56   ;;  %v49_v56 = vld [vmem:[%s3226_s2 + $0x80] sm:$0xff] }
0x1705   :  { %1301 = vperm.xlu1 %2633, %v2697_v62  }
0x1709   :  { %1320 = vperm.xlu1 %2633, %v24_v18   ;;  %v1409_v18 = vadd.s32 8, %v1408_v63 }
0x170b   :  { %v1421_v19 = vand.u32 1, %v1409_v18 }
0x170d   :  { %1521 = vrot.lane.b32.xlu1 %v3021_v32, %s2746_s22  ;;  %v45_v32 = vld [vmem:[%s3226_s2 + $0x60] sm:$0xff]  ;;  %vm1435_vm13 = vcmp.eq.s32.totalorder %v1421_v19, %v2799_v9 }
0x170e   :  { %2555 = vmatpush3.msra.mxu1 %v45_v32 }
0x1766   :  { %v1245_v13 = vpop.permute.xlu1 %1244 }
0x1767   :  { %v1247_v31 = vmul.f32 %v1245_v13, %v2883_v45 }
0x1768   :  { %v1250_v24 = vpop.permute.xlu0 %1249 }
0x1769   :  { %v1252_v22 = vmul.f32 %v1250_v24, %v2905_v2 }
0x176a   :  { %v1259_v25 = vpop.permute.xlu1 %1258 }
0x176b   :  { %v1254_v15 = vrot.slane %v1252_v22, 2  ;;  %v1261_v27 = vmul.f32 %v1259_v25, %v2927_v34  ;;  %v1437_v22 = vsel %vm1435_vm13, 1.0, %v2743_v5 }
0x176c   :  { %v1268_v26 = vpop.permute.xlu0 %1267 }
0x176d   :  { %v1256_v17 = vadd.f32 %v1254_v15, %v1247_v31  ;;  %v1263_v28 = vrot.slane %v1261_v27, 4  ;;  %v1270_v33 = vmul.f32 %v1268_v26, %v2949_v57  ;;  %v2329_v15 = vld [vmem:[%s3227_s3 + $0x4] ss:$0 sm:$0xff]  ;;  %s2747_s3 = smov 32  }
0x176f   :  { %v1265_v36 = vadd.f32 %v1263_v28, %v1256_v17  ;;  %v1272_v37 = vrot.slane %v1270_v33, 6 }
0x1770   :  { %v1278_v29 = vpop.permute.xlu0 %1277 }
0x1771   :  { %v1274_v40 = vadd.f32 %v1272_v37, %v1265_v36  ;;  %v1280_v34 = vmul.f32 %v1278_v29, %v2969_v20  ;;  %v52_v20 = vld [vmem:[%s3226_s2 + $0x98] sm:$0xff] }
0x1773   :  { %v1281_v43 = vadd.f32 %v1280_v34, %v1274_v40 }
0x1774   :  { %v1293_v35 = vpop.permute.xlu0 %1292 }
0x1775   :  { %v1295_v42 = vmul.f32 %v1293_v35, %v3003_v0 }
0x1777   :  { %v1297_v47 = vrot.slane %v1295_v42, 4 }
0x1778   :  { %v1318_v38 = vpop.permute.xlu0 %1317  ;;  %v1312_v39 = vpop.permute.xlu1 %1311 }
0x1779   :  { %vm1322_vm9 = vcmp.eq.s32.totalorder %v2799_v9, %v1318_v38  ;;  %2698 = vrcp.f32 %v1312_v39 }
0x177a   :  { %v1324_v2 = vsel %vm1322_vm9, 1.0, %v2743_v5 }
0x177b   :  { %2545 = vmatprep.mubr.msk.f32.mxu0 %vm164_vm4, %v1324_v2 }
0x177c   :  { %v1284_v45 = vpop.permute.xlu1 %1283 }
0x177d   :  { %v1286_v57 = vmul.f32 %v1284_v45, %v2991_v41 }
0x177f   :  { %v1288_v44 = vrot.slane %v1286_v57, 2 }
0x1780   :  { %v1302_v46 = vpop.permute.xlu1 %1301 }
0x1781   :  { %v1290_v48 = vadd.f32 %v1288_v44, %v1281_v43  ;;  %v1304_v49 = vmul.f32 %v1302_v46, %v3017_v16  ;;  %v51_v16 = vld [vmem:[%s3226_s2 + $0x90] sm:$0xff] }
0x1783   :  { %v1299_v50 = vadd.f32 %v1297_v47, %v1290_v48  ;;  %v1306_v51 = vrot.slane %v1304_v49, 6 }
0x1784   :  { %v1321_v52 = vpop.permute.xlu1 %1320 }
0x1785   :  { %v1308_v53 = vadd.f32 %v1306_v51, %v1299_v50  ;;  %vm1323_vm10 = vcmp.eq.s32.totalorder %v2799_v9, %v1321_v52 }
0x1786   :  { %v2699_v0 = vpop.eup %2698  ;;  %v1325_v41 = vsel %vm1323_vm10, 1.0, %v2743_v5 }
0x1787   :  { %2546 = vmatmul.mubr.msk.f32.vlgmr.msra.gmra.mxu0 %vm164_vm4, %v1325_v41  ;;  %v1315_v54 = vmul.f32 %v2699_v0, %v1308_v53  ;;  %v61_v41 = vld [vmem:[%s3228_s4 + $0x18] sm:$0xff] }
0x1788   :  { %2560 = vmatpush3.msra.mxu0 %v52_v20  ;;  %2567 = vmatprep.mubr.msk.f32.mxu0 %vm2744_vm3, %v2743_v5  ;;  %v1522_v59 = vpop.permute.xlu1 %1521 }
0x1789   :  { %2561 = vmatprep.subr.mxu0 %v2743_v5  ;;  %1443 = vrot.lane.b32.xlu0 %v1315_v54, %s2746_s22  ;;  %v60_v54 = vld [vmem:[%s3228_s4 + $0x10] sm:$0xff] }
0x178a   :  { %2562 = vmatpush3.msra.mxu0 %v51_v16 }
0x178b   :  { %2563 = vmatprep.subr.mxu0 %v2743_v5 }
0x178c   :  { %2564 = vmatpush3.msra.mxu0 %v50_v55 }
0x178d   :  { %2565 = vmatprep.subr.mxu0 %v2743_v5 }
0x178e   :  { %2566 = vmatpush3.msra.mxu0 %v49_v56  ;;  %v59_v56 = vld [vmem:[%s3228_s4 + $0x8] sm:$0xff] }
0x178f   :  { %2568 = vmatmul.mubr.msk.f32.vlgmr.msra.gmra.mxu0 %vm164_vm4, %v1522_v59  ;;  %2575 = vmatprep.subr.mxu0 %v44_v58 }
0x1790   :  { %2576 = vmatpush3.msra.mxu0 %v44_v58  ;;  %v58_v58 = vld [vmem:[%s3228_s4] sm:$0xff] }
0x1791   :  { %2577 = vmatprep.subr.mxu0 %v43_v30 }
0x1792   :  { %2578 = vmatpush3.msra.mxu0 %v43_v30 }
0x1793   :  { %2579 = vmatprep.subr.mxu0 %v42_v60 }
0x1794   :  { %2580 = vmatpush3.msra.mxu0 %v42_v60 }
0x1795   :  { %2581 = vmatprep.subr.mxu0 %v41_v61 }
0x1796   :  { %2582 = vmatpush3.msra.mxu0 %v41_v61 }
0x1797   :  { %2596 = vmatprep.subr.mxu0 %v2743_v5 }
0x17fb   :  { %v1444_v62 = vpop.permute.xlu0 %1443 }
0x17fc   :  { %2557 = vmatmul.mubr.msk.f32.vlgmr.msra.gmra.mxu1 %vm164_vm4, %v1444_v62 }
0x17fd   :  { %2572 = vmatprep.mubr.msk.f32.mxu1 %vm1595_vm11, %v1436_v3 }
0x1847   :  { %v2547_v4 = vpop.f32.mrf.mxu0 }
0x1849   :  { %v1398_v6 = vpop.f32.mrf.mxu0 }
0x184a   :  { %2583 = vmatprep.mubr.msk.f32.mxu0 %vm164_vm4, %v1398_v6 }
0x184b   :  { %2584 = vmatmul.mubr.msk.f32.vlgmr.msra.gmra.mxu0 %vm164_vm4, %v2547_v4 }
0x184c   :  { %2597 = vmatpush3.msra.mxu0 %v65_v7  ;;  %2604 = vmatprep.mubr.msk.f32.mxu0 %vm2744_vm3, %v2743_v5 }
0x184d   :  { %2598 = vmatprep.subr.mxu0 %v2743_v5 }
0x184e   :  { %2599 = vmatpush3.msra.mxu0 %v64_v8 }
0x184f   :  { %v1591_v11 = vpop.f32.mrf.mxu0  ;;  %2600 = vmatprep.subr.mxu0 %v2743_v5 }
0x1850   :  { %2601 = vmatpush3.msra.mxu0 %v63_v10  ;;  %v1592_v25 = vadd.f32 %v2314_v23, %v1591_v11 }
0x1851   :  { %v2569_v14 = vpop.f32.mrf.mxu0  ;;  %2602 = vmatprep.subr.mxu0 %v2743_v5 }
0x1852   :  { %2603 = vmatpush3.msra.mxu0 %v62_v12 }
0x1853   :  { %2605 = vmatmul.mubr.msk.f32.vlgmr.msra.gmra.mxu0 %vm164_vm4, %v1444_v62 }
0x18bc   :  { %v1513_v32 = vpop.f32.mrf.mxu1 }
0x18bd   :  { %v1514_v13 = vadd.f32 %v2312_v21, %v1513_v32 }
0x18be   :  { %v2558_v24 = vpop.f32.mrf.mxu1 }
0x18bf   :  { %2570 = vmatprep.subr.msk.mxu1 %vm1602_vm14, %v1514_v13  ;;  %v26_v24 = vld [vmem:[%s3224_s0 + $0x28] sm:$0xff] }
0x18c0   :  { %2571 = vmatpush3.msk.msra.mxu1 %vm1602_vm14, %v1514_v13 }
0x18c1   :  { %2573 = vmatmul.mubr.msk.f32.vlgmr.msra.gmra.mxu1 %vm1595_vm11, %v1437_v22  ;;  %2586 = vmatprep.subr.msk.mxu1 %vm1602_vm14, %v1592_v25 }
0x18c2   :  { %2587 = vmatpush3.msk.msra.mxu1 %vm1602_vm14, %v1592_v25  ;;  %2588 = vmatprep.mubr.msk.f32.mxu1 %vm1595_vm11, %v1436_v3 }
0x18c3   :  { %2591 = vmatprep.subr.msk.mxu1 %vm1602_vm14, %v1522_v59 }
0x18c5   :  { %2589 = vmatmul.mubr.msk.f32.vlgmr.msra.gmra.mxu1 %vm1595_vm11, %v1437_v22 }
0x18c6   :  { %2592 = vmatpush3.msk.msra.mxu1 %vm1602_vm14, %v1522_v59  ;;  %2593 = vmatprep.mubr.msk.f32.mxu1 %vm1595_vm11, %v1436_v3 }
0x18c9   :  { %2594 = vmatmul.mubr.msk.f32.vlgmr.msra.gmra.mxu1 %vm1595_vm11, %v1437_v22 }
0x18ca   :  { %2609 = vmatprep.mubr.msk.f32.mxu1 %vm1595_vm11, %v1436_v3 }
0x190b   :  { %v2585_v5 = vpop.f32.mrf.mxu0 }
0x190d   :  { %v1753_v26 = vpop.f32.mrf.mxu0 }
0x1913   :  { %v2047_v27 = vpop.f32.mrf.mxu0 }
0x1914   :  { %v2048_v29 = vadd.f32 %v2329_v15, %v2047_v27 }
0x1915   :  { %v2606_v31 = vpop.f32.mrf.mxu0 }
0x1916   :  { %2607 = vmatprep.subr.msk.mxu1 %vm1602_vm14, %v2048_v29 }
0x1917   :  { %2608 = vmatpush3.msk.msra.mxu1 %vm1602_vm14, %v2048_v29 }
0x1918   :  { %2610 = vmatmul.mubr.msk.f32.vlgmr.msra.gmra.mxu1 %vm1595_vm11, %v1437_v22  ;;  %2612 = vmatprep.subr.mxu1 %v61_v41  ;;  %v25_v22 = vld [vmem:[%s3224_s0 + $0x20] sm:$0xff]  ;;  %s2748_s0 = smov [#allocation2]  }
0x1919   :  { %2613 = vmatpush3.msra.mxu1 %v61_v41  ;;  %s2281_s8 = sshll.u32 %s2748_s0, 4  ;;  %s2282_s8 = int_to_ptr.vmem [resolvable:$true] %s2281_s8 }
0x191a   :  { %2614 = vmatprep.subr.mxu1 %v60_v54  ;;  %s2720_s10 = scalar_lea.vmem %s2282_s8, 16  ;;  %s2724_s11 = scalar_lea.vmem %s2282_s8, 32 }
0x191b   :  { %2615 = vmatpush3.msra.mxu1 %v60_v54  ;;  %p2721_p0 = scmp.ne.s32.totalorder %s2282_s8, %s2720_s10  ;;  %p2725_p1 = scmp.lt.s32.totalorder %s2282_s8, %s2282_s8 }
0x191c   :  { %2616 = vmatprep.subr.mxu1 %v59_v56  ;;  %p2726_p2 = scmp.lt.s32.totalorder %s2724_s11, %s2720_s10 }
0x191d   :  { %2617 = vmatpush3.msra.mxu1 %v59_v56 }
0x191e   :  { %2618 = vmatprep.subr.mxu1 %v58_v58  ;;  %p2727_p3 = por %p2726_p2, %p2725_p1 }
0x191f   :  { %2619 = vmatpush3.msra.mxu1 %v58_v58 }
0x1920   :  { %p2728_p4 = pnand %p2727_p3, %p2721_p0 }
0x1981   :  { %v2574_v17 = vpop.f32.mrf.mxu1 }
0x1982   :  { %v1759_v36 = vadd.f32 %v2585_v5, %v2574_v17 }
0x1983   :  { %v1672_v28 = vpop.f32.mrf.mxu1 }
0x1984   :  { %v1754_v37 = vadd.f32 %v1753_v26, %v1672_v28 }
0x1985   :  { %v2590_v33 = vpop.f32.mrf.mxu1 }
0x1986   :  { %1935 = vrot.lane.b32.xlu1 %v2590_v33, %s2745_s19  ;;  %v1918_v38 = vadd.f32 %v2590_v33, %v1759_v36 }
0x1987   :  { %v1831_v35 = vpop.f32.mrf.mxu1 }
0x1988   :  { %1933 = vrot.lane.b32.xlu0 %v1831_v35, %s2745_s19  ;;  %v1917_v39 = vadd.f32 %v1831_v35, %v1754_v37  ;;  %v2328_v2 = vmul.f32 -1.442695, %v1918_v38 }
0x1989   :  { %v2595_v46 = vpop.f32.mrf.mxu1 }
0x198a   :  { %v2327_v40 = vmul.f32 -1.442695, %v1917_v39  ;;  %2700 = vpow2.f32 %v2328_v2 }
0x198b   :  { %v1908_v51 = vpop.f32.mrf.mxu1 }
0x198c   :  { %2702 = vpow2.f32 %v2327_v40 }
0x1997   :  { %v2701_v34 = vpop.eup %2700 }
0x1998   :  { %v1926_v42 = vadd.f32 1.0, %v2701_v34 }
0x1999   :  { %v2703_v45 = vpop.eup %2702 }
0x199a   :  { %v1925_v57 = vadd.f32 1.0, %v2703_v45  ;;  %2704 = vrcp.f32 %v1926_v42 }
0x199c   :  { %2706 = vrcp.f32 %v1925_v57 }
0x19a7   :  { %v2705_v43 = vpop.eup %2704 }
0x19a8   :  { %v1954_v3 = vsub.f32 1.0, %v2705_v43 }
0x19a9   :  { %v2707_v48 = vpop.eup %2706 }
0x19aa   :  { %v1953_v30 = vsub.f32 1.0, %v2707_v48 }
0x19d8   :  { %v2611_v12 = vpop.f32.mrf.mxu1 }
0x19da   :  { %v2120_v14 = vpop.f32.mrf.mxu1 }
0x19f8   :  { %v1936_v44 = vpop.permute.xlu1 %1935 }
0x19f9   :  { %v1940_v47 = vmul.f32 %v2705_v43, %v1936_v44 }
0x19fa   :  { %v1934_v49 = vpop.permute.xlu0 %1933 }
0x19fb   :  { %v1939_v50 = vmul.f32 %v2707_v48, %v1934_v49  ;;  %1945 = vrot.lane.b32.xlu1 %v1940_v47, %s2745_s19 }
0x19fd   :  { %1943 = vrot.lane.b32.xlu0 %v1939_v50, %s2745_s19 }
0x19ff   :  { %1967 = vrot.lane.b32.xlu1 %v1908_v51, %s2747_s3 }
0x1a03   :  { %1969 = vrot.lane.b32.xlu1 %v2595_v46, %s2747_s3 }
0x1a6d   :  { %v1946_v52 = vpop.permute.xlu1 %1945 }
0x1a6e   :  { %v1950_v0 = vadd.f32 %v1946_v52, %v1759_v36 }
0x1a6f   :  { %v1944_v53 = vpop.permute.xlu0 %1943 }
0x1a70   :  { %v1949_v20 = vadd.f32 %v1944_v53, %v1754_v37 }
0x1a71   :  { %v1968_v59 = vpop.permute.xlu1 %1967 }
0x1a72   :  { %2708 = vtanh.f32 %v1949_v20  ;;  %v1973_v61 = vmul.f32 %v2707_v48, %v1968_v59 }
0x1a73   :  { %2710 = vtanh.f32 %v1950_v0 }
0x1a75   :  { %v1970_v63 = vpop.permute.xlu1 %1969 }
0x1a76   :  { %v1974_v6 = vmul.f32 %v2705_v43, %v1970_v63 }
0x1a7f   :  { %v2709_v16 = vpop.eup %2708 }
0x1a80   :  { %1957 = vrot.lane.b32.xlu0 %v2709_v16, %s2746_s22  ;;  %v2711_v55 = vpop.eup %2710 }
0x1a84   :  { %1959 = vrot.lane.b32.xlu0 %v2711_v55, %s2746_s22 }
0x1af2   :  { %v1958_v60 = vpop.permute.xlu0 %1957 }
0x1af3   :  { %v1963_v62 = vmul.f32 %v1958_v60, %v1953_v30 }
0x1af5   :  { %v1975_v1 = vadd.f32 %v1973_v61, %v1963_v62 }
0x1af6   :  { %v1960_v4 = vpop.permute.xlu0 %1959 }
0x1af7   :  { %v1964_v7 = vmul.f32 %v1960_v4, %v1954_v3  ;;  %2131 = vrot.lane.b32.xlu0 %v1975_v1, %s2746_s22 }
0x1af9   :  { %v1976_v8 = vadd.f32 %v1974_v6, %v1964_v7 }
0x1afb   :  { %2133 = vrot.lane.b32.xlu1 %v1976_v8, %s2746_s22 }
0x1b69   :  { %v2132_v10 = vpop.permute.xlu0 %2131 }
0x1b6a   :  { %2620 = vmatprep.mubr.msk.f32.mxu1 %vm164_vm4, %v2132_v10 }
0x1b6d   :  { %v2134_v11 = vpop.permute.xlu1 %2133 }
0x1b6e   :  { %2621 = vmatmul.mubr.msk.f32.vlgmr.msra.gmra.mxu1 %vm164_vm4, %v2134_v11 }
0x1c2e   :  { %v2622_v18 = vpop.f32.mrf.mxu1 }
0x1c2f   :  { %v2211_v19 = vadd.f32 %v2622_v18, %v2611_v12 }
0x1c30   :  { %v2205_v21 = vpop.f32.mrf.mxu1 }
0x1c31   :  { %v2206_v23 = vadd.f32 %v2205_v21, %v2120_v14  ;;  %v2217_v32 = vsel %vm164_vm4, %v2211_v19, -inf }
0x1c32   :  { %2218 = vmax.xlane.f32.xlu1 %v2217_v32 }
0x1c33   :  { %v2214_v13 = vsel %vm164_vm4, %v2206_v23, -inf }
0x1c34   :  { %2215 = vmax.xlane.f32.xlu0 %v2214_v13 }
0x1c43   :  { %2242 = vperm.xlu1 %2633, %v26_v24  }
0x1c4a   :  { %2239 = vperm.xlu0 %2632, %v25_v22  }
0x1cbb   :  { %v2219_v25 = vpop.xlane.xlu1 %2218 }
0x1cbc   :  { %v2221_v5 = vsub.f32 %v2211_v19, %v2219_v25 }
0x1cbd   :  { %v2216_v26 = vpop.xlane.xlu0 %2215 }
0x1cbe   :  { %v2224_v15 = vmul.f32 1.442695, %v2221_v5  ;;  %v2220_v27 = vsub.f32 %v2206_v23, %v2216_v26 }
0x1cbf   :  { %v2243_v35 = vpop.permute.xlu1 %2242 }
0x1cc0   :  { %2712 = vpow2.f32 %v2224_v15  ;;  %v2222_v29 = vmul.f32 1.442695, %v2220_v27  ;;  %vm2245_vm0 = vcmp.eq.s32.totalorder %v2799_v9, %v2243_v35 }
0x1cc1   :  { %v2247_v39 = vsel %vm2245_vm0, %v2211_v19, 0.0 }
0x1cc2   :  { %2714 = vpow2.f32 %v2222_v29  ;;  %v2251_v2 = vsel %vm164_vm4, %v2247_v39, 0.0 }
0x1cc5   :  { %v2240_v31 = vpop.permute.xlu0 %2239 }
0x1cc6   :  { %vm2244_vm15 = vcmp.eq.s32.totalorder %v2799_v9, %v2240_v31 }
0x1cc7   :  { %v2246_v37 = vsel %vm2244_vm15, %v2206_v23, 0.0 }
0x1cc8   :  { %v2248_v38 = vsel %vm164_vm4, %v2246_v37, 0.0 }
0x1ccd   :  { %v2713_v17 = vpop.eup %2712 }
0x1cce   :  { %v2229_v28 = vsel %vm164_vm4, %v2713_v17, 0.0 }
0x1ccf   :  { %v2715_v33 = vpop.eup %2714  ;;  %2230 = vadd.xlane.f32.xlu1 %v2229_v28 }
0x1cd0   :  { %v2226_v36 = vsel %vm164_vm4, %v2715_v33, 0.0 }
0x1cd1   :  { %2227 = vadd.xlane.f32.xlu0 %v2226_v36 }
0x1cd5   :  { %2249 = vadd.xlane.f32.xlu0 %v2248_v38 }
0x1cd9   :  { %2252 = vadd.xlane.f32.xlu0 %v2251_v2 }
0x1d58   :  { %v2231_v40 = vpop.xlane.xlu1 %2230 }
0x1d59   :  { %2716 = vlog2.f32 %v2231_v40 }
0x1d5a   :  { %v2228_v34 = vpop.xlane.xlu0 %2227 }
0x1d5b   :  { %2718 = vlog2.f32 %v2228_v34 }
0x1d5e   :  { %v2250_v45 = vpop.xlane.xlu0 %2249 }
0x1d62   :  { %v2253_v47 = vpop.xlane.xlu0 %2252 }
0x1d66   :  { %v2717_v42 = vpop.eup %2716 }
0x1d67   :  { %v2235_v57 = vmul.f32 0.6931472, %v2717_v42 }
0x1d68   :  { %v2719_v43 = vpop.eup %2718 }
0x1d69   :  { %v2233_v44 = vmul.f32 0.6931472, %v2719_v43  ;;  %v2237_v46 = vadd.f32 %v2235_v57, %v2219_v25 }
0x1d6b   :  { %v2236_v48 = vadd.f32 %v2233_v44, %v2216_v26  ;;  %v2255_v9 = vsub.f32 %v2237_v46, %v2253_v47 }
0x1d6d   :  { %v2254_v49 = vsub.f32 %v2236_v48, %v2250_v45  ;;  %v2258_v51 = vsel %vm2256_vm1, %v2255_v9, 0.0 }
0x1d6f   :  { %v2257_v50 = vsel %vm2256_vm1, %v2254_v49, 0.0 }
0x1d70   :  { %v2259_v52 = vadd.f32 %v2258_v51, %v2257_v50 }
0x1d72   :  { %2260 = vadd.xlane.f32.xlu1 %v2259_v52 }
0x1dfb   :  { %v2261_v53 = vpop.xlane.xlu1 %2260 }
0x1dfc   :  { %v2262_v20 = vrot.slane %v2261_v53, 4 }
0x1dfe   :  { %v2263_v0 = vadd.f32 %v2262_v20, %v2261_v53 }
0x1e00   :  { %v2264_v41 = vrot.slane %v2263_v0, 2 }
0x1e02   :  { %v2265_v54 = vadd.f32 %v2264_v41, %v2263_v0 }
0x1e04   :  { %v2266_v16 = vrot.slane %v2265_v54, 1 }
0x1e06   :  { %v2267_v55 = vadd.f32 %v2266_v16, %v2265_v54 }
0x1e08   :  { %2623 = vpush %v2267_v55 }
0x1e39   :  { %s2624_s9 = spop %2623 }
0x1e3a   :  { %s2271_s2 = smul.f32 0.0625, %s2624_s9 }
0x1e3c   :  { %v2272_v56 = vstv %s2271_s2 }
0x1e3d   :  { %2274 = vst.msk [vmem:[#allocation2] sm:$0x1] %vm2273_vm2, %v2272_v56 }
0x1e3e   :  { %2731 = shalt.err (!%p2728_p4)
}
0x1e3f   :  { %2284 = dma.vmem_to_hbm [thread:$0]  %s2282_s8, 16, %s3229_s5, [#allocation3]  }
0x1e40   :  { %2740 = dma.done.wait [#allocation3], 16  }
0x1e41   :  { %2741 = vsyncadd [#allocation3], 4294967280 }
0x1e42   :  { %2288 = vsyncpa [#allocation3], 1 }

</bundles_post_ra>
